<compile_context>
chip_gen: v6e
topology: v6e:2x2x1
jax: 0.10.0
libtpu: 0.0.40
codegen_flags: <defaults>
</compile_context>

<pallas_src>
import functools
import math

import jax
import jax.numpy as jnp
from jax.experimental import pallas as pl
from jax.experimental.pallas import tpu as pltpu


def _round_up(n, m):
    return ((n + m - 1) // m) * m


def _pad_gate_cols(w, h, h_pad):
    """Pad each of the 4 gate column blocks of a fused (rows, 4h) matrix."""
    if h_pad == h:
        return w
    rows = w.shape[0]
    w4 = w.reshape(rows, 4, h)
    w4 = jnp.pad(w4, ((0, 0), (0, 0), (0, h_pad - h)))
    return w4.reshape(rows, 4 * h_pad)


def _pad_row_blocks(w, nblk, h, h_pad):
    """Pad each of the `nblk` row blocks of a (nblk*h, cols) matrix to h_pad rows."""
    if h_pad == h:
        return w
    cols = w.shape[1]
    w3 = w.reshape(nblk, h, cols)
    w3 = jnp.pad(w3, ((0, 0), (0, h_pad - h), (0, 0)))
    return w3.reshape(nblk * h_pad, cols)


def _lstm_chunk_kernel(*refs, nt, t_valid, revs):
    """One grid step = one chunk of `nt` time steps for all `len(revs)` directions.

    refs layout (n = len(revs)):
      inputs : x_0..x_{n-1}        (nt*Bp, D)  bf16  chunk of layer input
               b_0..b_{n-1}        (1, 4Hp)    f32   fused bias
               wih_0..wih_{n-1}    (D, 4Hp)    bf16  HBM (memory_space=ANY)
               whh_0..whh_{n-1}    (Hp, 4Hp)   bf16  HBM (memory_space=ANY)
      outputs: out_0..out_{n-1}    (nt, Bp, Hp)
      scratch: wih_sc, whh_sc, xp_sc, h_sc, c_sc (each n refs), dma_sem
    """
    n = len(revs)
    x_refs = refs[0:n]
    b_refs = refs[n:2 * n]
    wih_hbm = refs[2 * n:3 * n]
    whh_hbm = refs[3 * n:4 * n]
    out_refs = refs[4 * n:5 * n]
    wih_sc = refs[5 * n:6 * n]
    whh_sc = refs[6 * n:7 * n]
    xp_sc = refs[7 * n:8 * n]
    h_sc = refs[8 * n:9 * n]
    c_sc = refs[9 * n:10 * n]
    sem = refs[10 * n]

    bp, hp = h_sc[0].shape
    cid = pl.program_id(0)
    nchunks = pl.num_programs(0)

    # Load the weights once (single-buffered VMEM residents) and zero carries.
    @pl.when(cid == 0)
    def _():
        cps = []
        for d in range(n):
            cps.append(pltpu.make_async_copy(wih_hbm[d], wih_sc[d], sem.at[2 * d]))
            cps.append(pltpu.make_async_copy(whh_hbm[d], whh_sc[d], sem.at[2 * d + 1]))
        for cp in cps:
            cp.start()
        for cp in cps:
            cp.wait()
        for d in range(n):
            h_sc[d][...] = jnp.zeros_like(h_sc[d])
            c_sc[d][...] = jnp.zeros_like(c_sc[d])

    # Fused input projection for the whole chunk: one (nt*Bp, D) x (D, 4Hp)
    # MXU matmul per direction (far better row utilization than the per-step
    # M=Bp matmul), f32 accumulation, bias folded in.  No HBM intermediate.
    for d in range(n):
        xp_sc[d][...] = (
            jnp.dot(x_refs[d][...], wih_sc[d][...],
                    preferred_element_type=jnp.float32)
            + b_refs[d][...])

    # Serial recurrence over the chunk.  The directions of a bidirectional
    # layer are interleaved per step so their independent matmuls / gate
    # chains overlap on a single TensorCore.  Carries live in VMEM scratch
    # (bounded vreg live ranges across the unrolled loop).
    for k in range(nt):
        for d in range(n):
            rev = revs[d]
            t = (nt - 1 - k) if rev else k
            cg = (nchunks - 1 - cid) if rev else cid        # global chunk index
            valid = (cg * nt + t) < t_valid                 # mask padded steps

            @pl.when(valid)
            def _(d=d, t=t):
                pre = (xp_sc[d][pl.ds(t * bp, bp), :]
                       + jnp.dot(h_sc[d][...].astype(jnp.bfloat16),
                                 whh_sc[d][...],
                                 preferred_element_type=jnp.float32))
                i_g = jax.nn.sigmoid(pre[:, 0 * hp:1 * hp])
                f_g = jax.nn.sigmoid(pre[:, 1 * hp:2 * hp])
                g_g = jnp.tanh(pre[:, 2 * hp:3 * hp])
                o_g = jax.nn.sigmoid(pre[:, 3 * hp:4 * hp])
                c_new = f_g * c_sc[d][...] + i_g * g_g
                h_new = o_g * jnp.tanh(c_new)
                c_sc[d][...] = c_new
                h_sc[d][...] = h_new
                out_refs[d][t] = h_new.astype(out_refs[d].dtype)


def _lstm_layer_fwd(x_flat, biases, w_ihs, w_hhs, revs, t_valid, tt, bp, hp,
                    out_dtype):
    """x_flat: (Tp*Bp, D) bf16.  Returns a list of (Tp, Bp, Hp) arrays per dir."""
    ndir = len(revs)
    tot, d_in = x_flat.shape
    tp = tot // bp
    nc = tp // tt
    g = 4 * hp

    def x_idx(rev):
        if rev:
            return lambda c: (nc - 1 - c, 0)
        return lambda c: (c, 0)

    def out_idx(rev):
        if rev:
            return lambda c: (nc - 1 - c, 0, 0)
        return lambda c: (c, 0, 0)

    in_specs = (
        [pl.BlockSpec((tt * bp, d_in), x_idx(r)) for r in revs]
        + [pl.BlockSpec((1, g), lambda c: (0, 0)) for _ in revs]
        + [pl.BlockSpec(memory_space=pl.ANY) for _ in revs]     # W_ih (HBM)
        + [pl.BlockSpec(memory_space=pl.ANY) for _ in revs])    # W_hh (HBM)
    out_specs = [pl.BlockSpec((tt, bp, hp), out_idx(r)) for r in revs]
    out_shapes = [jax.ShapeDtypeStruct((tp, bp, hp), out_dtype) for _ in revs]

    scratch = (
        [pltpu.VMEM((d_in, g), jnp.bfloat16) for _ in revs]      # W_ih resident
        + [pltpu.VMEM((hp, g), jnp.bfloat16) for _ in revs]      # W_hh resident
        + [pltpu.VMEM((tt * bp, g), jnp.float32) for _ in revs]  # chunk xproj
        + [pltpu.VMEM((bp, hp), jnp.float32) for _ in revs]      # h carry
        + [pltpu.VMEM((bp, hp), jnp.float32) for _ in revs]      # c carry
        + [pltpu.SemaphoreType.DMA((2 * ndir,))])

    out_isz = jnp.dtype(out_dtype).itemsize
    vmem = ndir * (
        2 * tt * bp * d_in * 2            # x blocks (bf16, double-buffered)
        + 2 * 8 * g * 4                   # bias blocks (sublane-padded)
        + 2 * tt * bp * hp * out_isz      # out blocks (double-buffered)
        + _round_up(d_in, 8) * g * 2      # W_ih scratch (single copy)
        + hp * g * 2                      # W_hh scratch (single copy)
        + tt * bp * g * 4                 # chunk projection scratch
        + 2 * bp * hp * 4)                # carries
    # Always set the scoped-VMEM limit (v5e defaults to only 16 MiB); cap at
    # the 128 MiB of v5e/v6e.  TODO(synk): on v7x (64 MiB physical VMEM) with
    # large Hp, tile W_hh over the gate axis and/or shrink time_chunk.
    limit = int(min(max(vmem + (vmem >> 2) + (2 << 20), 16 << 20), 128 << 20))

    kernel = functools.partial(_lstm_chunk_kernel, nt=tt, t_valid=t_valid,
                               revs=tuple(revs))
    outs = pl.pallas_call(
        kernel,
        out_shape=out_shapes,
        grid_spec=pltpu.PrefetchScalarGridSpec(
            num_scalar_prefetch=0,
            grid=(nc,),
            in_specs=in_specs,
            out_specs=out_specs,
            scratch_shapes=scratch),
        compiler_params=pltpu.CompilerParams(
            dimension_semantics=("arbitrary",),   # time recurrence is serial
            vmem_limit_bytes=limit),
    )(*([x_flat] * ndir), *biases, *w_ihs, *w_hhs)
    if not isinstance(outs, (list, tuple)):
        outs = [outs]
    return list(outs)


class PallasLSTM:
    """Mirrors spinn.util.blocks.LSTM (forward only, zero initial state)."""

    def __init__(self, inp_dim, model_dim, num_layers=1, reverse=False,
                 bidirectional=False, dropout=None, key=None, time_chunk=16):
        del dropout  # TODO(synk): inter-layer dropout (training only) not implemented.
        self.bi = 2 if bidirectional else 1
        assert model_dim % self.bi == 0
        self.model_dim = model_dim
        self.reverse = reverse
        self.bidirectional = bidirectional
        self.num_layers = num_layers
        self.hidden = model_dim // self.bi
        self.hidden_pad = _round_up(self.hidden, 128)
        self.inp_dim = inp_dim
        self.inp_pad = _round_up(inp_dim, 128)   # lane-aligned layer-0 features
        # Larger chunks amortize the ~0.35us per-grid-step cost; tune per
        # generation (larger on v5e/v6e, smaller on v7x where VMEM is 64 MiB).
        self.time_chunk = time_chunk

        if key is None:
            key = jax.random.PRNGKey(0)
        H, Hp = self.hidden, self.hidden_pad
        kscale = 1.0 / math.sqrt(H)

        self.params = []      # [layer][dir] -> padded (w_ih bf16, w_hh bf16, b f32)
        self.ref_params = []  # [layer][dir] -> unpadded fused f32 (for reference)
        for layer in range(num_layers):
            d_in = inp_dim if layer == 0 else model_dim
            dirs, ref_dirs = [], []
            for _ in range(self.bi):
                key, k1, k2, k3, k4 = jax.random.split(key, 5)
                # torch layout: (4H, in) with gate-row blocks (i, f, g, o).
                w_ih = jax.random.uniform(k1, (4 * H, d_in), jnp.float32, -kscale, kscale)
                w_hh = jax.random.uniform(k2, (4 * H, H), jnp.float32, -kscale, kscale)
                b_ih = jax.random.uniform(k3, (4 * H,), jnp.float32, -kscale, kscale)
                b_hh = jax.random.uniform(k4, (4 * H,), jnp.float32, -kscale, kscale)

                w_ih_t = w_ih.T                   # (d_in, 4H)
                w_hh_t = w_hh.T                   # (H, 4H)
                b = (b_ih + b_hh)[None, :]        # (1, 4H)
                ref_dirs.append((w_ih_t, w_hh_t, b))

                w_ih_p = _pad_gate_cols(w_ih_t, H, Hp)         # (d_in, 4Hp)
                if layer == 0:
                    w_ih_p = _pad_row_blocks(w_ih_p, 1, d_in, self.inp_pad)
                else:
                    # Deeper-layer inputs arrive Hp-padded per direction; padded
                    # hidden lanes are exactly zero, so zero the matching rows.
                    w_ih_p = _pad_row_blocks(w_ih_p, self.bi, H, Hp)
                w_ih_p = w_ih_p.astype(jnp.bfloat16)

                w_hh_p = _pad_gate_cols(w_hh_t, H, Hp)
                w_hh_p = jnp.pad(w_hh_p, ((0, Hp - H), (0, 0))).astype(jnp.bfloat16)
                b_p = _pad_gate_cols(b, H, Hp)    # f32, zeros in padded cols
                dirs.append((w_ih_p, w_hh_p, b_p))
            self.params.append(dirs)
            self.ref_params.append(ref_dirs)

        self._forward = jax.jit(self._forward_impl)

    def _forward_impl(self, x):
        B, T, _ = x.shape
        Bp = _round_up(B, 8)
        tt = min(self.time_chunk, T)
        Tp = _round_up(T, tt)
        H, Hp = self.hidden, self.hidden_pad

        # Time-major once; pad batch / time / features once (x is the smallest
        # tensor; the old (T, Bp, 4Hp) f32 projection intermediate is gone).
        inp = jnp.transpose(x, (1, 0, 2))
        inp = jnp.pad(inp, ((0, Tp - T), (0, Bp - B),
                            (0, self.inp_pad - self.inp_dim)))
        x_flat = inp.astype(jnp.bfloat16).reshape(Tp * Bp, -1)

        # dir 0 follows self.reverse; the backward direction of a bidirectional
        # layer processes the opposite time order.
        revs = ([self.reverse] if self.bi == 1
                else [self.reverse, not self.reverse])

        for layer in range(self.num_layers):
            last = layer == self.num_layers - 1
            out_dtype = jnp.float32 if last else jnp.bfloat16
            wihs = [p[0] for p in self.params[layer]]
            whhs = [p[1] for p in self.params[layer]]
            bs = [p[2] for p in self.params[layer]]
            outs = _lstm_layer_fwd(x_flat, bs, wihs, whhs, revs, T, tt, Bp, Hp,
                                   out_dtype)                  # [(Tp, Bp, Hp)]
            if last:
                outs = [o[:T, :B, :H] for o in outs]
                y = outs[0] if self.bi == 1 else jnp.concatenate(outs, axis=-1)
                return jnp.transpose(y, (1, 0, 2))             # (B, T, model_dim)
            nxt = outs[0] if self.bi == 1 else jnp.concatenate(outs, axis=-1)
            x_flat = nxt.reshape(Tp * Bp, -1)                  # bf16, Hp-padded

    def __call__(self, x, h0=None, c0=None):
        # TODO(synk): non-zero initial states not supported (module defaults to zeros).
        assert h0 is None and c0 is None
        return self._forward(x)


# ----------------------------- pure-JAX reference ----------------------------

def _lstm_layer_ref(x_tm, w_ih, w_hh, b, reverse):
    """Single direction, f32. x_tm: (T, B, D); fused weights; returns (T, B, H)."""
    T, B, _ = x_tm.shape
    H = w_hh.shape[0]
    xs = jnp.flip(x_tm, axis=0) if reverse else x_tm

    def step(carry, x_t):
        h, c = carry
        pre = x_t @ w_ih + h @ w_hh + b
        i = jax.nn.sigmoid(pre[:, :H])
        f = jax.nn.sigmoid(pre[:, H:2 * H])
        g = jnp.tanh(pre[:, 2 * H:3 * H])
        o = jax.nn.sigmoid(pre[:, 3 * H:])
        c = f * c + i * g
        h = o * jnp.tanh(c)
        return (h, c), h

    init = (jnp.zeros((B, H), jnp.float32), jnp.zeros((B, H), jnp.float32))
    _, hs = jax.lax.scan(step, init, xs)
    return jnp.flip(hs, axis=0) if reverse else hs


def _module_ref(lstm, x):
    """Literal f32 mirror of the PyTorch module forward."""
    if lstm.reverse:
        x = jnp.flip(x, axis=1)
    inp = jnp.transpose(x, (1, 0, 2))
    for layer in range(lstm.num_layers):
        outs = []
        for d in range(lstm.bi):
            w_ih, w_hh, b = lstm.ref_params[layer][d]
            outs.append(_lstm_layer_ref(inp, w_ih, w_hh, b, reverse=(d == 1)))
        inp = outs[0] if lstm.bi == 1 else jnp.concatenate(outs, axis=-1)
    out = jnp.transpose(inp, (1, 0, 2))
    if lstm.reverse:
        out = jnp.flip(out, axis=1)
    return out


if __name__ == "__main__":
    batch, seq_len, inp_dim, model_dim = 2, 8, 16, 32

    key = jax.random.PRNGKey(0)
    kx, kx2, kp1, kp2, kp3 = jax.random.split(key, 5)
    x = jax.random.normal(kx, (batch, seq_len, inp_dim), jnp.float32)

    # 1) Unidirectional, single layer.
    lstm = PallasLSTM(inp_dim, model_dim, num_layers=1, key=kp1)
    out = jax.block_until_ready(lstm(x))
    assert out.shape == (batch, seq_len, model_dim), out.shape
    ref = _module_ref(lstm, x)
    err = float(jnp.max(jnp.abs(out - ref)))
    assert err < 3e-2, err   # bf16 matmul inputs vs f32 reference

    # 2) Bidirectional, reversed, 2 layers (fused two-direction kernel,
    #    reversed index_maps, bf16 inter-layer activations, stacking).
    lstm2 = PallasLSTM(inp_dim, model_dim, num_layers=2, reverse=True,
                       bidirectional=True, key=kp2)
    out2 = jax.block_until_ready(lstm2(x))
    assert out2.shape == (batch, seq_len, model_dim), out2.shape
    ref2 = _module_ref(lstm2, x)
    err2 = float(jnp.max(jnp.abs(out2 - ref2)))
    assert err2 < 5e-2, err2

    # 3) Ragged sequence length (T not a multiple of time_chunk) exercises the
    #    in-kernel validity masking for both time directions.
    x3 = jax.random.normal(kx2, (batch, 11, inp_dim), jnp.float32)
    lstm3 = PallasLSTM(inp_dim, model_dim, num_layers=2, reverse=True,
                       bidirectional=True, key=kp3, time_chunk=4)
    out3 = jax.block_until_ready(lstm3(x3))
    assert out3.shape == (batch, 11, model_dim), out3.shape
    ref3 = _module_ref(lstm3, x3)
    err3 = float(jnp.max(jnp.abs(out3 - ref3)))
    assert err3 < 6e-2, err3

    print("KERNEL_OK")
</pallas_src>

<mosaic_0001>
module attributes {stable_mosaic.version = 11 : i64} {
  func.func @_lstm_chunk_kernel(%arg0: i32, %arg1: memref<64x128xbf16, #tpu.memory_space<vmem>>, %arg2: memref<1x512xf32, #tpu.memory_space<vmem>>, %arg3: memref<128x512xbf16, #tpu.memory_space<any>>, %arg4: memref<128x512xbf16, #tpu.memory_space<any>>, %arg5: memref<8x8x128xf32, #tpu.memory_space<vmem>>, %arg6: memref<128x512xbf16, #tpu.memory_space<vmem>>, %arg7: memref<128x512xbf16, #tpu.memory_space<vmem>>, %arg8: memref<64x512xf32, #tpu.memory_space<vmem>>, %arg9: memref<8x128xf32, #tpu.memory_space<vmem>>, %arg10: memref<8x128xf32, #tpu.memory_space<vmem>>, %arg11: memref<2x!tpu.dma_semaphore, #tpu.memory_space<semaphore_mem>>) attributes {dimension_semantics = [#tpu.dimension_semantics<arbitrary>], iteration_bounds = array<i64: 1>, scalar_prefetch = 0 : i64, scratch_operands = 6 : i64, tpu.core_type = #tpu.core_type<tc>, window_params = [{transform_indices = @transform_0, window_bounds = array<i64: 64, 128>}, {pipeline_mode = #tpu.pipeline_mode<synchronous>, transform_indices = @transform_1, window_bounds = array<i64: 1, 512>}, {}, {}, {transform_indices = @transform_4, window_bounds = array<i64: 8, 8, 128>}]} {
    %c0_i32 = arith.constant 0 : i32
    %0 = arith.cmpi eq, %arg0, %c0_i32 : i32
    %1 = arith.extui %0 : i1 to i32
    %c0_i32_0 = arith.constant 0 : i32
    %2 = arith.cmpi ne, %1, %c0_i32_0 : i32
    scf.if %2 {
      %c0_i32_32 = arith.constant 0 : i32
      %50 = tpu.memref_slice %arg11[%c0_i32_32] : memref<2x!tpu.dma_semaphore, #tpu.memory_space<semaphore_mem>> -> memref<1x!tpu.dma_semaphore, #tpu.memory_space<semaphore_mem>>
      %51 = tpu.memref_squeeze %50 : memref<1x!tpu.dma_semaphore, #tpu.memory_space<semaphore_mem>> -> memref<!tpu.dma_semaphore, #tpu.memory_space<semaphore_mem>>
      tpu.enqueue_dma source(%arg3 : memref<128x512xbf16, #tpu.memory_space<any>>) target(%arg6 : memref<128x512xbf16, #tpu.memory_space<vmem>>) target_semaphore(%51 : memref<!tpu.dma_semaphore, #tpu.memory_space<semaphore_mem>>)
      %c1_i32_33 = arith.constant 1 : i32
      %52 = tpu.memref_slice %arg11[%c1_i32_33] : memref<2x!tpu.dma_semaphore, #tpu.memory_space<semaphore_mem>> -> memref<1x!tpu.dma_semaphore, #tpu.memory_space<semaphore_mem>>
      %53 = tpu.memref_squeeze %52 : memref<1x!tpu.dma_semaphore, #tpu.memory_space<semaphore_mem>> -> memref<!tpu.dma_semaphore, #tpu.memory_space<semaphore_mem>>
      tpu.enqueue_dma source(%arg4 : memref<128x512xbf16, #tpu.memory_space<any>>) target(%arg7 : memref<128x512xbf16, #tpu.memory_space<vmem>>) target_semaphore(%53 : memref<!tpu.dma_semaphore, #tpu.memory_space<semaphore_mem>>)
      %c0_i32_34 = arith.constant 0 : i32
      %54 = tpu.memref_slice %arg11[%c0_i32_34] : memref<2x!tpu.dma_semaphore, #tpu.memory_space<semaphore_mem>> -> memref<1x!tpu.dma_semaphore, #tpu.memory_space<semaphore_mem>>
      %55 = tpu.memref_squeeze %54 : memref<1x!tpu.dma_semaphore, #tpu.memory_space<semaphore_mem>> -> memref<!tpu.dma_semaphore, #tpu.memory_space<semaphore_mem>>
      tpu.wait_dma2 semaphore(%55 : memref<!tpu.dma_semaphore, #tpu.memory_space<semaphore_mem>>) src(%arg3 : memref<128x512xbf16, #tpu.memory_space<any>>) dst(%arg6 : memref<128x512xbf16, #tpu.memory_space<vmem>>)
      %c1_i32_35 = arith.constant 1 : i32
      %56 = tpu.memref_slice %arg11[%c1_i32_35] : memref<2x!tpu.dma_semaphore, #tpu.memory_space<semaphore_mem>> -> memref<1x!tpu.dma_semaphore, #tpu.memory_space<semaphore_mem>>
      %57 = tpu.memref_squeeze %56 : memref<1x!tpu.dma_semaphore, #tpu.memory_space<semaphore_mem>> -> memref<!tpu.dma_semaphore, #tpu.memory_space<semaphore_mem>>
      tpu.wait_dma2 semaphore(%57 : memref<!tpu.dma_semaphore, #tpu.memory_space<semaphore_mem>>) src(%arg4 : memref<128x512xbf16, #tpu.memory_space<any>>) dst(%arg7 : memref<128x512xbf16, #tpu.memory_space<vmem>>)
      %cst_36 = arith.constant 0.000000e+00 : f32
      %58 = vector.broadcast %cst_36 : f32 to vector<8x128xf32>
      %c0_37 = arith.constant 0 : index
      %c0_38 = arith.constant 0 : index
      %59 = vector.load %arg9[%c0_37, %c0_38] : memref<8x128xf32, #tpu.memory_space<vmem>>, vector<8x128xf32>
      tpu.vector_store %arg9[%c0_37, %c0_38], %58 {strides = array<i32>} : memref<8x128xf32, #tpu.memory_space<vmem>>, vector<8x128xf32>,
      %cst_39 = arith.constant 0.000000e+00 : f32
      %60 = vector.broadcast %cst_39 : f32 to vector<8x128xf32>
      %c0_40 = arith.constant 0 : index
      %c0_41 = arith.constant 0 : index
      %61 = vector.load %arg10[%c0_40, %c0_41] : memref<8x128xf32, #tpu.memory_space<vmem>>, vector<8x128xf32>
      tpu.vector_store %arg10[%c0_40, %c0_41], %60 {strides = array<i32>} : memref<8x128xf32, #tpu.memory_space<vmem>>, vector<8x128xf32>,
    } else {
    }
    %c0 = arith.constant 0 : index
    %c0_1 = arith.constant 0 : index
    %3 = vector.load %arg1[%c0, %c0_1] : memref<64x128xbf16, #tpu.memory_space<vmem>>, vector<64x128xbf16>
    %c0_2 = arith.constant 0 : index
    %c0_3 = arith.constant 0 : index
    %4 = vector.load %arg6[%c0_2, %c0_3] : memref<128x512xbf16, #tpu.memory_space<vmem>>, vector<128x512xbf16>
    %cst = arith.constant dense<0.000000e+00> : vector<64x512xf32>
    %5 = tpu.matmul %3, %4, %cst {dimension_numbers = #tpu.dot_dimension_numbers<[1], [0], [0], [1], [0, 0, 1, 1], [], []>} : vector<64x128xbf16>, vector<128x512xbf16>, vector<64x512xf32> -> vector<64x512xf32>
    %c0_4 = arith.constant 0 : index
    %c0_5 = arith.constant 0 : index
    %6 = vector.load %arg2[%c0_4, %c0_5] : memref<1x512xf32, #tpu.memory_space<vmem>>, vector<1x512xf32>
    %7 = vector.broadcast %6 : vector<1x512xf32> to vector<64x512xf32>
    %8 = arith.addf %5, %7 : vector<64x512xf32>
    %c0_6 = arith.constant 0 : index
    %c0_7 = arith.constant 0 : index
    %9 = vector.load %arg8[%c0_6, %c0_7] : memref<64x512xf32, #tpu.memory_space<vmem>>, vector<64x512xf32>
    tpu.vector_store %arg8[%c0_6, %c0_7], %8 {strides = array<i32>} : memref<64x512xf32, #tpu.memory_space<vmem>>, vector<64x512xf32>,
    %c8_i32 = arith.constant 8 : i32
    %10 = arith.muli %arg0, %c8_i32 : i32
    %c0_i32_8 = arith.constant 0 : i32
    %11 = arith.addi %10, %c0_i32_8 : i32
    %c8_i32_9 = arith.constant 8 : i32
    %12 = arith.cmpi slt, %11, %c8_i32_9 : i32
    %13 = arith.extui %12 : i1 to i32
    %c0_i32_10 = arith.constant 0 : i32
    %14 = arith.cmpi ne, %13, %c0_i32_10 : i32
    scf.if %14 {
      %c0_32 = arith.constant 0 : index
      %c0_33 = arith.constant 0 : index
      %50 = vector.load %arg8[%c0_32, %c0_33] : memref<64x512xf32, #tpu.memory_space<vmem>>, vector<8x512xf32>
      %c0_34 = arith.constant 0 : index
      %c0_35 = arith.constant 0 : index
      %51 = vector.load %arg9[%c0_34, %c0_35] : memref<8x128xf32, #tpu.memory_space<vmem>>, vector<8x128xf32>
      %52 = arith.truncf %51 : vector<8x128xf32> to vector<8x128xbf16>
      %c0_36 = arith.constant 0 : index
      %c0_37 = arith.constant 0 : index
      %53 = vector.load %arg7[%c0_36, %c0_37] : memref<128x512xbf16, #tpu.memory_space<vmem>>, vector<128x512xbf16>
      %cst_38 = arith.constant dense<0.000000e+00> : vector<8x512xf32>
      %54 = tpu.matmul %52, %53, %cst_38 {dimension_numbers = #tpu.dot_dimension_numbers<[1], [0], [0], [1], [0, 0, 1, 1], [], []>} : vector<8x128xbf16>, vector<128x512xbf16>, vector<8x512xf32> -> vector<8x512xf32>
      %55 = arith.addf %50, %54 : vector<8x512xf32>
      %56 = vector.extract_strided_slice %55 {offsets = [0, 0], sizes = [8, 128], strides = [1, 1]} : vector<8x512xf32> to vector<8x128xf32>
      %57 = arith.negf %56 : vector<8x128xf32>
      %58 = math.exp %57 : vector<8x128xf32>
      %cst_39 = arith.constant 1.000000e+00 : f32
      %59 = vector.broadcast %cst_39 : f32 to vector<8x128xf32>
      %60 = arith.addf %59, %58 : vector<8x128xf32>
      %61 = arith.divf %59, %60 : vector<8x128xf32>
      %62 = vector.extract_strided_slice %55 {offsets = [0, 128], sizes = [8, 128], strides = [1, 1]} : vector<8x512xf32> to vector<8x128xf32>
      %63 = arith.negf %62 : vector<8x128xf32>
      %64 = math.exp %63 : vector<8x128xf32>
      %cst_40 = arith.constant 1.000000e+00 : f32
      %65 = vector.broadcast %cst_40 : f32 to vector<8x128xf32>
      %66 = arith.addf %65, %64 : vector<8x128xf32>
      %67 = arith.divf %65, %66 : vector<8x128xf32>
      %68 = vector.extract_strided_slice %55 {offsets = [0, 256], sizes = [8, 128], strides = [1, 1]} : vector<8x512xf32> to vector<8x128xf32>
      %69 = math.tanh %68 : vector<8x128xf32>
      %70 = vector.extract_strided_slice %55 {offsets = [0, 384], sizes = [8, 128], strides = [1, 1]} : vector<8x512xf32> to vector<8x128xf32>
      %71 = arith.negf %70 : vector<8x128xf32>
      %72 = math.exp %71 : vector<8x128xf32>
      %cst_41 = arith.constant 1.000000e+00 : f32
      %73 = vector.broadcast %cst_41 : f32 to vector<8x128xf32>
      %74 = arith.addf %73, %72 : vector<8x128xf32>
      %75 = arith.divf %73, %74 : vector<8x128xf32>
      %c0_42 = arith.constant 0 : index
      %c0_43 = arith.constant 0 : index
      %76 = vector.load %arg10[%c0_42, %c0_43] : memref<8x128xf32, #tpu.memory_space<vmem>>, vector<8x128xf32>
      %77 = arith.mulf %67, %76 : vector<8x128xf32>
      %78 = arith.mulf %61, %69 : vector<8x128xf32>
      %79 = arith.addf %77, %78 : vector<8x128xf32>
      %80 = math.tanh %79 : vector<8x128xf32>
      %81 = arith.mulf %75, %80 : vector<8x128xf32>
      %c0_44 = arith.constant 0 : index
      %c0_45 = arith.constant 0 : index
      %82 = vector.load %arg10[%c0_44, %c0_45] : memref<8x128xf32, #tpu.memory_space<vmem>>, vector<8x128xf32>
      tpu.vector_store %arg10[%c0_44, %c0_45], %79 {strides = array<i32>} : memref<8x128xf32, #tpu.memory_space<vmem>>, vector<8x128xf32>,
      %c0_46 = arith.constant 0 : index
      %c0_47 = arith.constant 0 : index
      %83 = vector.load %arg9[%c0_46, %c0_47] : memref<8x128xf32, #tpu.memory_space<vmem>>, vector<8x128xf32>
      tpu.vector_store %arg9[%c0_46, %c0_47], %81 {strides = array<i32>} : memref<8x128xf32, #tpu.memory_space<vmem>>, vector<8x128xf32>,
      %c0_48 = arith.constant 0 : index
      %c0_49 = arith.constant 0 : index
      %c0_50 = arith.constant 0 : index
      %84 = vector.load %arg5[%c0_48, %c0_49, %c0_50] : memref<8x8x128xf32, #tpu.memory_space<vmem>>, vector<1x8x128xf32>
      %85 = vector.shape_cast %84 : vector<1x8x128xf32> to vector<8x128xf32>
      %86 = vector.shape_cast %81 : vector<8x128xf32> to vector<1x8x128xf32>
      tpu.vector_store %arg5[%c0_48, %c0_49, %c0_50], %86 {strides = array<i32>} : memref<8x8x128xf32, #tpu.memory_space<vmem>>, vector<1x8x128xf32>,
    } else {
    }
    %c8_i32_11 = arith.constant 8 : i32
    %15 = arith.muli %arg0, %c8_i32_11 : i32
    %c1_i32 = arith.constant 1 : i32
    %16 = arith.addi %15, %c1_i32 : i32
    %c8_i32_12 = arith.constant 8 : i32
    %17 = arith.cmpi slt, %16, %c8_i32_12 : i32
    %18 = arith.extui %17 : i1 to i32
    %c0_i32_13 = arith.constant 0 : i32
    %19 = arith.cmpi ne, %18, %c0_i32_13 : i32
    scf.if %19 {
      %c8 = arith.constant 8 : index
      %c0_32 = arith.constant 0 : index
      %50 = vector.load %arg8[%c8, %c0_32] : memref<64x512xf32, #tpu.memory_space<vmem>>, vector<8x512xf32>
      %c0_33 = arith.constant 0 : index
      %c0_34 = arith.constant 0 : index
      %51 = vector.load %arg9[%c0_33, %c0_34] : memref<8x128xf32, #tpu.memory_space<vmem>>, vector<8x128xf32>
      %52 = arith.truncf %51 : vector<8x128xf32> to vector<8x128xbf16>
      %c0_35 = arith.constant 0 : index
      %c0_36 = arith.constant 0 : index
      %53 = vector.load %arg7[%c0_35, %c0_36] : memref<128x512xbf16, #tpu.memory_space<vmem>>, vector<128x512xbf16>
      %cst_37 = arith.constant dense<0.000000e+00> : vector<8x512xf32>
      %54 = tpu.matmul %52, %53, %cst_37 {dimension_numbers = #tpu.dot_dimension_numbers<[1], [0], [0], [1], [0, 0, 1, 1], [], []>} : vector<8x128xbf16>, vector<128x512xbf16>, vector<8x512xf32> -> vector<8x512xf32>
      %55 = arith.addf %50, %54 : vector<8x512xf32>
      %56 = vector.extract_strided_slice %55 {offsets = [0, 0], sizes = [8, 128], strides = [1, 1]} : vector<8x512xf32> to vector<8x128xf32>
      %57 = arith.negf %56 : vector<8x128xf32>
      %58 = math.exp %57 : vector<8x128xf32>
      %cst_38 = arith.constant 1.000000e+00 : f32
      %59 = vector.broadcast %cst_38 : f32 to vector<8x128xf32>
      %60 = arith.addf %59, %58 : vector<8x128xf32>
      %61 = arith.divf %59, %60 : vector<8x128xf32>
      %62 = vector.extract_strided_slice %55 {offsets = [0, 128], sizes = [8, 128], strides = [1, 1]} : vector<8x512xf32> to vector<8x128xf32>
      %63 = arith.negf %62 : vector<8x128xf32>
      %64 = math.exp %63 : vector<8x128xf32>
      %cst_39 = arith.constant 1.000000e+00 : f32
      %65 = vector.broadcast %cst_39 : f32 to vector<8x128xf32>
      %66 = arith.addf %65, %64 : vector<8x128xf32>
      %67 = arith.divf %65, %66 : vector<8x128xf32>
      %68 = vector.extract_strided_slice %55 {offsets = [0, 256], sizes = [8, 128], strides = [1, 1]} : vector<8x512xf32> to vector<8x128xf32>
      %69 = math.tanh %68 : vector<8x128xf32>
      %70 = vector.extract_strided_slice %55 {offsets = [0, 384], sizes = [8, 128], strides = [1, 1]} : vector<8x512xf32> to vector<8x128xf32>
      %71 = arith.negf %70 : vector<8x128xf32>
      %72 = math.exp %71 : vector<8x128xf32>
      %cst_40 = arith.constant 1.000000e+00 : f32
      %73 = vector.broadcast %cst_40 : f32 to vector<8x128xf32>
      %74 = arith.addf %73, %72 : vector<8x128xf32>
      %75 = arith.divf %73, %74 : vector<8x128xf32>
      %c0_41 = arith.constant 0 : index
      %c0_42 = arith.constant 0 : index
      %76 = vector.load %arg10[%c0_41, %c0_42] : memref<8x128xf32, #tpu.memory_space<vmem>>, vector<8x128xf32>
      %77 = arith.mulf %67, %76 : vector<8x128xf32>
      %78 = arith.mulf %61, %69 : vector<8x128xf32>
      %79 = arith.addf %77, %78 : vector<8x128xf32>
      %80 = math.tanh %79 : vector<8x128xf32>
      %81 = arith.mulf %75, %80 : vector<8x128xf32>
      %c0_43 = arith.constant 0 : index
      %c0_44 = arith.constant 0 : index
      %82 = vector.load %arg10[%c0_43, %c0_44] : memref<8x128xf32, #tpu.memory_space<vmem>>, vector<8x128xf32>
      tpu.vector_store %arg10[%c0_43, %c0_44], %79 {strides = array<i32>} : memref<8x128xf32, #tpu.memory_space<vmem>>, vector<8x128xf32>,
      %c0_45 = arith.constant 0 : index
      %c0_46 = arith.constant 0 : index
      %83 = vector.load %arg9[%c0_45, %c0_46] : memref<8x128xf32, #tpu.memory_space<vmem>>, vector<8x128xf32>
      tpu.vector_store %arg9[%c0_45, %c0_46], %81 {strides = array<i32>} : memref<8x128xf32, #tpu.memory_space<vmem>>, vector<8x128xf32>,
      %c1 = arith.constant 1 : index
      %c0_47 = arith.constant 0 : index
      %c0_48 = arith.constant 0 : index
      %84 = vector.load %arg5[%c1, %c0_47, %c0_48] : memref<8x8x128xf32, #tpu.memory_space<vmem>>, vector<1x8x128xf32>
      %85 = vector.shape_cast %84 : vector<1x8x128xf32> to vector<8x128xf32>
      %86 = vector.shape_cast %81 : vector<8x128xf32> to vector<1x8x128xf32>
      tpu.vector_store %arg5[%c1, %c0_47, %c0_48], %86 {strides = array<i32>} : memref<8x8x128xf32, #tpu.memory_space<vmem>>, vector<1x8x128xf32>,
    } else {
    }
    %c8_i32_14 = arith.constant 8 : i32
    %20 = arith.muli %arg0, %c8_i32_14 : i32
    %c2_i32 = arith.constant 2 : i32
    %21 = arith.addi %20, %c2_i32 : i32
    %c8_i32_15 = arith.constant 8 : i32
    %22 = arith.cmpi slt, %21, %c8_i32_15 : i32
    %23 = arith.extui %22 : i1 to i32
    %c0_i32_16 = arith.constant 0 : i32
    %24 = arith.cmpi ne, %23, %c0_i32_16 : i32
    scf.if %24 {
      %c16 = arith.constant 16 : index
      %c0_32 = arith.constant 0 : index
      %50 = vector.load %arg8[%c16, %c0_32] : memref<64x512xf32, #tpu.memory_space<vmem>>, vector<8x512xf32>
      %c0_33 = arith.constant 0 : index
      %c0_34 = arith.constant 0 : index
      %51 = vector.load %arg9[%c0_33, %c0_34] : memref<8x128xf32, #tpu.memory_space<vmem>>, vector<8x128xf32>
      %52 = arith.truncf %51 : vector<8x128xf32> to vector<8x128xbf16>
      %c0_35 = arith.constant 0 : index
      %c0_36 = arith.constant 0 : index
      %53 = vector.load %arg7[%c0_35, %c0_36] : memref<128x512xbf16, #tpu.memory_space<vmem>>, vector<128x512xbf16>
      %cst_37 = arith.constant dense<0.000000e+00> : vector<8x512xf32>
      %54 = tpu.matmul %52, %53, %cst_37 {dimension_numbers = #tpu.dot_dimension_numbers<[1], [0], [0], [1], [0, 0, 1, 1], [], []>} : vector<8x128xbf16>, vector<128x512xbf16>, vector<8x512xf32> -> vector<8x512xf32>
      %55 = arith.addf %50, %54 : vector<8x512xf32>
      %56 = vector.extract_strided_slice %55 {offsets = [0, 0], sizes = [8, 128], strides = [1, 1]} : vector<8x512xf32> to vector<8x128xf32>
      %57 = arith.negf %56 : vector<8x128xf32>
      %58 = math.exp %57 : vector<8x128xf32>
      %cst_38 = arith.constant 1.000000e+00 : f32
      %59 = vector.broadcast %cst_38 : f32 to vector<8x128xf32>
      %60 = arith.addf %59, %58 : vector<8x128xf32>
      %61 = arith.divf %59, %60 : vector<8x128xf32>
      %62 = vector.extract_strided_slice %55 {offsets = [0, 128], sizes = [8, 128], strides = [1, 1]} : vector<8x512xf32> to vector<8x128xf32>
      %63 = arith.negf %62 : vector<8x128xf32>
      %64 = math.exp %63 : vector<8x128xf32>
      %cst_39 = arith.constant 1.000000e+00 : f32
      %65 = vector.broadcast %cst_39 : f32 to vector<8x128xf32>
      %66 = arith.addf %65, %64 : vector<8x128xf32>
      %67 = arith.divf %65, %66 : vector<8x128xf32>
      %68 = vector.extract_strided_slice %55 {offsets = [0, 256], sizes = [8, 128], strides = [1, 1]} : vector<8x512xf32> to vector<8x128xf32>
      %69 = math.tanh %68 : vector<8x128xf32>
      %70 = vector.extract_strided_slice %55 {offsets = [0, 384], sizes = [8, 128], strides = [1, 1]} : vector<8x512xf32> to vector<8x128xf32>
      %71 = arith.negf %70 : vector<8x128xf32>
      %72 = math.exp %71 : vector<8x128xf32>
      %cst_40 = arith.constant 1.000000e+00 : f32
      %73 = vector.broadcast %cst_40 : f32 to vector<8x128xf32>
      %74 = arith.addf %73, %72 : vector<8x128xf32>
      %75 = arith.divf %73, %74 : vector<8x128xf32>
      %c0_41 = arith.constant 0 : index
      %c0_42 = arith.constant 0 : index
      %76 = vector.load %arg10[%c0_41, %c0_42] : memref<8x128xf32, #tpu.memory_space<vmem>>, vector<8x128xf32>
      %77 = arith.mulf %67, %76 : vector<8x128xf32>
      %78 = arith.mulf %61, %69 : vector<8x128xf32>
      %79 = arith.addf %77, %78 : vector<8x128xf32>
      %80 = math.tanh %79 : vector<8x128xf32>
      %81 = arith.mulf %75, %80 : vector<8x128xf32>
      %c0_43 = arith.constant 0 : index
      %c0_44 = arith.constant 0 : index
      %82 = vector.load %arg10[%c0_43, %c0_44] : memref<8x128xf32, #tpu.memory_space<vmem>>, vector<8x128xf32>
      tpu.vector_store %arg10[%c0_43, %c0_44], %79 {strides = array<i32>} : memref<8x128xf32, #tpu.memory_space<vmem>>, vector<8x128xf32>,
      %c0_45 = arith.constant 0 : index
      %c0_46 = arith.constant 0 : index
      %83 = vector.load %arg9[%c0_45, %c0_46] : memref<8x128xf32, #tpu.memory_space<vmem>>, vector<8x128xf32>
      tpu.vector_store %arg9[%c0_45, %c0_46], %81 {strides = array<i32>} : memref<8x128xf32, #tpu.memory_space<vmem>>, vector<8x128xf32>,
      %c2 = arith.constant 2 : index
      %c0_47 = arith.constant 0 : index
      %c0_48 = arith.constant 0 : index
      %84 = vector.load %arg5[%c2, %c0_47, %c0_48] : memref<8x8x128xf32, #tpu.memory_space<vmem>>, vector<1x8x128xf32>
      %85 = vector.shape_cast %84 : vector<1x8x128xf32> to vector<8x128xf32>
      %86 = vector.shape_cast %81 : vector<8x128xf32> to vector<1x8x128xf32>
      tpu.vector_store %arg5[%c2, %c0_47, %c0_48], %86 {strides = array<i32>} : memref<8x8x128xf32, #tpu.memory_space<vmem>>, vector<1x8x128xf32>,
    } else {
    }
    %c8_i32_17 = arith.constant 8 : i32
    %25 = arith.muli %arg0, %c8_i32_17 : i32
    %c3_i32 = arith.constant 3 : i32
    %26 = arith.addi %25, %c3_i32 : i32
    %c8_i32_18 = arith.constant 8 : i32
    %27 = arith.cmpi slt, %26, %c8_i32_18 : i32
    %28 = arith.extui %27 : i1 to i32
    %c0_i32_19 = arith.constant 0 : i32
    %29 = arith.cmpi ne, %28, %c0_i32_19 : i32
    scf.if %29 {
      %c24 = arith.constant 24 : index
      %c0_32 = arith.constant 0 : index
      %50 = vector.load %arg8[%c24, %c0_32] : memref<64x512xf32, #tpu.memory_space<vmem>>, vector<8x512xf32>
      %c0_33 = arith.constant 0 : index
      %c0_34 = arith.constant 0 : index
      %51 = vector.load %arg9[%c0_33, %c0_34] : memref<8x128xf32, #tpu.memory_space<vmem>>, vector<8x128xf32>
      %52 = arith.truncf %51 : vector<8x128xf32> to vector<8x128xbf16>
      %c0_35 = arith.constant 0 : index
      %c0_36 = arith.constant 0 : index
      %53 = vector.load %arg7[%c0_35, %c0_36] : memref<128x512xbf16, #tpu.memory_space<vmem>>, vector<128x512xbf16>
      %cst_37 = arith.constant dense<0.000000e+00> : vector<8x512xf32>
      %54 = tpu.matmul %52, %53, %cst_37 {dimension_numbers = #tpu.dot_dimension_numbers<[1], [0], [0], [1], [0, 0, 1, 1], [], []>} : vector<8x128xbf16>, vector<128x512xbf16>, vector<8x512xf32> -> vector<8x512xf32>
      %55 = arith.addf %50, %54 : vector<8x512xf32>
      %56 = vector.extract_strided_slice %55 {offsets = [0, 0], sizes = [8, 128], strides = [1, 1]} : vector<8x512xf32> to vector<8x128xf32>
      %57 = arith.negf %56 : vector<8x128xf32>
      %58 = math.exp %57 : vector<8x128xf32>
      %cst_38 = arith.constant 1.000000e+00 : f32
      %59 = vector.broadcast %cst_38 : f32 to vector<8x128xf32>
      %60 = arith.addf %59, %58 : vector<8x128xf32>
      %61 = arith.divf %59, %60 : vector<8x128xf32>
      %62 = vector.extract_strided_slice %55 {offsets = [0, 128], sizes = [8, 128], strides = [1, 1]} : vector<8x512xf32> to vector<8x128xf32>
      %63 = arith.negf %62 : vector<8x128xf32>
      %64 = math.exp %63 : vector<8x128xf32>
      %cst_39 = arith.constant 1.000000e+00 : f32
      %65 = vector.broadcast %cst_39 : f32 to vector<8x128xf32>
      %66 = arith.addf %65, %64 : vector<8x128xf32>
      %67 = arith.divf %65, %66 : vector<8x128xf32>
      %68 = vector.extract_strided_slice %55 {offsets = [0, 256], sizes = [8, 128], strides = [1, 1]} : vector<8x512xf32> to vector<8x128xf32>
      %69 = math.tanh %68 : vector<8x128xf32>
      %70 = vector.extract_strided_slice %55 {offsets = [0, 384], sizes = [8, 128], strides = [1, 1]} : vector<8x512xf32> to vector<8x128xf32>
      %71 = arith.negf %70 : vector<8x128xf32>
      %72 = math.exp %71 : vector<8x128xf32>
      %cst_40 = arith.constant 1.000000e+00 : f32
      %73 = vector.broadcast %cst_40 : f32 to vector<8x128xf32>
      %74 = arith.addf %73, %72 : vector<8x128xf32>
      %75 = arith.divf %73, %74 : vector<8x128xf32>
      %c0_41 = arith.constant 0 : index
      %c0_42 = arith.constant 0 : index
      %76 = vector.load %arg10[%c0_41, %c0_42] : memref<8x128xf32, #tpu.memory_space<vmem>>, vector<8x128xf32>
      %77 = arith.mulf %67, %76 : vector<8x128xf32>
      %78 = arith.mulf %61, %69 : vector<8x128xf32>
      %79 = arith.addf %77, %78 : vector<8x128xf32>
      %80 = math.tanh %79 : vector<8x128xf32>
      %81 = arith.mulf %75, %80 : vector<8x128xf32>
      %c0_43 = arith.constant 0 : index
      %c0_44 = arith.constant 0 : index
      %82 = vector.load %arg10[%c0_43, %c0_44] : memref<8x128xf32, #tpu.memory_space<vmem>>, vector<8x128xf32>
      tpu.vector_store %arg10[%c0_43, %c0_44], %79 {strides = array<i32>} : memref<8x128xf32, #tpu.memory_space<vmem>>, vector<8x128xf32>,
      %c0_45 = arith.constant 0 : index
      %c0_46 = arith.constant 0 : index
      %83 = vector.load %arg9[%c0_45, %c0_46] : memref<8x128xf32, #tpu.memory_space<vmem>>, vector<8x128xf32>
      tpu.vector_store %arg9[%c0_45, %c0_46], %81 {strides = array<i32>} : memref<8x128xf32, #tpu.memory_space<vmem>>, vector<8x128xf32>,
      %c3 = arith.constant 3 : index
      %c0_47 = arith.constant 0 : index
      %c0_48 = arith.constant 0 : index
      %84 = vector.load %arg5[%c3, %c0_47, %c0_48] : memref<8x8x128xf32, #tpu.memory_space<vmem>>, vector<1x8x128xf32>
      %85 = vector.shape_cast %84 : vector<1x8x128xf32> to vector<8x128xf32>
      %86 = vector.shape_cast %81 : vector<8x128xf32> to vector<1x8x128xf32>
      tpu.vector_store %arg5[%c3, %c0_47, %c0_48], %86 {strides = array<i32>} : memref<8x8x128xf32, #tpu.memory_space<vmem>>, vector<1x8x128xf32>,
    } else {
    }
    %c8_i32_20 = arith.constant 8 : i32
    %30 = arith.muli %arg0, %c8_i32_20 : i32
    %c4_i32 = arith.constant 4 : i32
    %31 = arith.addi %30, %c4_i32 : i32
    %c8_i32_21 = arith.constant 8 : i32
    %32 = arith.cmpi slt, %31, %c8_i32_21 : i32
    %33 = arith.extui %32 : i1 to i32
    %c0_i32_22 = arith.constant 0 : i32
    %34 = arith.cmpi ne, %33, %c0_i32_22 : i32
    scf.if %34 {
      %c32 = arith.constant 32 : index
      %c0_32 = arith.constant 0 : index
      %50 = vector.load %arg8[%c32, %c0_32] : memref<64x512xf32, #tpu.memory_space<vmem>>, vector<8x512xf32>
      %c0_33 = arith.constant 0 : index
      %c0_34 = arith.constant 0 : index
      %51 = vector.load %arg9[%c0_33, %c0_34] : memref<8x128xf32, #tpu.memory_space<vmem>>, vector<8x128xf32>
      %52 = arith.truncf %51 : vector<8x128xf32> to vector<8x128xbf16>
      %c0_35 = arith.constant 0 : index
      %c0_36 = arith.constant 0 : index
      %53 = vector.load %arg7[%c0_35, %c0_36] : memref<128x512xbf16, #tpu.memory_space<vmem>>, vector<128x512xbf16>
      %cst_37 = arith.constant dense<0.000000e+00> : vector<8x512xf32>
      %54 = tpu.matmul %52, %53, %cst_37 {dimension_numbers = #tpu.dot_dimension_numbers<[1], [0], [0], [1], [0, 0, 1, 1], [], []>} : vector<8x128xbf16>, vector<128x512xbf16>, vector<8x512xf32> -> vector<8x512xf32>
      %55 = arith.addf %50, %54 : vector<8x512xf32>
      %56 = vector.extract_strided_slice %55 {offsets = [0, 0], sizes = [8, 128], strides = [1, 1]} : vector<8x512xf32> to vector<8x128xf32>
      %57 = arith.negf %56 : vector<8x128xf32>
      %58 = math.exp %57 : vector<8x128xf32>
      %cst_38 = arith.constant 1.000000e+00 : f32
      %59 = vector.broadcast %cst_38 : f32 to vector<8x128xf32>
      %60 = arith.addf %59, %58 : vector<8x128xf32>
      %61 = arith.divf %59, %60 : vector<8x128xf32>
      %62 = vector.extract_strided_slice %55 {offsets = [0, 128], sizes = [8, 128], strides = [1, 1]} : vector<8x512xf32> to vector<8x128xf32>
      %63 = arith.negf %62 : vector<8x128xf32>
      %64 = math.exp %63 : vector<8x128xf32>
      %cst_39 = arith.constant 1.000000e+00 : f32
      %65 = vector.broadcast %cst_39 : f32 to vector<8x128xf32>
      %66 = arith.addf %65, %64 : vector<8x128xf32>
      %67 = arith.divf %65, %66 : vector<8x128xf32>
      %68 = vector.extract_strided_slice %55 {offsets = [0, 256], sizes = [8, 128], strides = [1, 1]} : vector<8x512xf32> to vector<8x128xf32>
      %69 = math.tanh %68 : vector<8x128xf32>
      %70 = vector.extract_strided_slice %55 {offsets = [0, 384], sizes = [8, 128], strides = [1, 1]} : vector<8x512xf32> to vector<8x128xf32>
      %71 = arith.negf %70 : vector<8x128xf32>
      %72 = math.exp %71 : vector<8x128xf32>
      %cst_40 = arith.constant 1.000000e+00 : f32
      %73 = vector.broadcast %cst_40 : f32 to vector<8x128xf32>
      %74 = arith.addf %73, %72 : vector<8x128xf32>
      %75 = arith.divf %73, %74 : vector<8x128xf32>
      %c0_41 = arith.constant 0 : index
      %c0_42 = arith.constant 0 : index
      %76 = vector.load %arg10[%c0_41, %c0_42] : memref<8x128xf32, #tpu.memory_space<vmem>>, vector<8x128xf32>
      %77 = arith.mulf %67, %76 : vector<8x128xf32>
      %78 = arith.mulf %61, %69 : vector<8x128xf32>
      %79 = arith.addf %77, %78 : vector<8x128xf32>
      %80 = math.tanh %79 : vector<8x128xf32>
      %81 = arith.mulf %75, %80 : vector<8x128xf32>
      %c0_43 = arith.constant 0 : index
      %c0_44 = arith.constant 0 : index
      %82 = vector.load %arg10[%c0_43, %c0_44] : memref<8x128xf32, #tpu.memory_space<vmem>>, vector<8x128xf32>
      tpu.vector_store %arg10[%c0_43, %c0_44], %79 {strides = array<i32>} : memref<8x128xf32, #tpu.memory_space<vmem>>, vector<8x128xf32>,
      %c0_45 = arith.constant 0 : index
      %c0_46 = arith.constant 0 : index
      %83 = vector.load %arg9[%c0_45, %c0_46] : memref<8x128xf32, #tpu.memory_space<vmem>>, vector<8x128xf32>
      tpu.vector_store %arg9[%c0_45, %c0_46], %81 {strides = array<i32>} : memref<8x128xf32, #tpu.memory_space<vmem>>, vector<8x128xf32>,
      %c4 = arith.constant 4 : index
      %c0_47 = arith.constant 0 : index
      %c0_48 = arith.constant 0 : index
      %84 = vector.load %arg5[%c4, %c0_47, %c0_48] : memref<8x8x128xf32, #tpu.memory_space<vmem>>, vector<1x8x128xf32>
      %85 = vector.shape_cast %84 : vector<1x8x128xf32> to vector<8x128xf32>
      %86 = vector.shape_cast %81 : vector<8x128xf32> to vector<1x8x128xf32>
      tpu.vector_store %arg5[%c4, %c0_47, %c0_48], %86 {strides = array<i32>} : memref<8x8x128xf32, #tpu.memory_space<vmem>>, vector<1x8x128xf32>,
    } else {
    }
    %c8_i32_23 = arith.constant 8 : i32
    %35 = arith.muli %arg0, %c8_i32_23 : i32
    %c5_i32 = arith.constant 5 : i32
    %36 = arith.addi %35, %c5_i32 : i32
    %c8_i32_24 = arith.constant 8 : i32
    %37 = arith.cmpi slt, %36, %c8_i32_24 : i32
    %38 = arith.extui %37 : i1 to i32
    %c0_i32_25 = arith.constant 0 : i32
    %39 = arith.cmpi ne, %38, %c0_i32_25 : i32
    scf.if %39 {
      %c40 = arith.constant 40 : index
      %c0_32 = arith.constant 0 : index
      %50 = vector.load %arg8[%c40, %c0_32] : memref<64x512xf32, #tpu.memory_space<vmem>>, vector<8x512xf32>
      %c0_33 = arith.constant 0 : index
      %c0_34 = arith.constant 0 : index
      %51 = vector.load %arg9[%c0_33, %c0_34] : memref<8x128xf32, #tpu.memory_space<vmem>>, vector<8x128xf32>
      %52 = arith.truncf %51 : vector<8x128xf32> to vector<8x128xbf16>
      %c0_35 = arith.constant 0 : index
      %c0_36 = arith.constant 0 : index
      %53 = vector.load %arg7[%c0_35, %c0_36] : memref<128x512xbf16, #tpu.memory_space<vmem>>, vector<128x512xbf16>
      %cst_37 = arith.constant dense<0.000000e+00> : vector<8x512xf32>
      %54 = tpu.matmul %52, %53, %cst_37 {dimension_numbers = #tpu.dot_dimension_numbers<[1], [0], [0], [1], [0, 0, 1, 1], [], []>} : vector<8x128xbf16>, vector<128x512xbf16>, vector<8x512xf32> -> vector<8x512xf32>
      %55 = arith.addf %50, %54 : vector<8x512xf32>
      %56 = vector.extract_strided_slice %55 {offsets = [0, 0], sizes = [8, 128], strides = [1, 1]} : vector<8x512xf32> to vector<8x128xf32>
      %57 = arith.negf %56 : vector<8x128xf32>
      %58 = math.exp %57 : vector<8x128xf32>
      %cst_38 = arith.constant 1.000000e+00 : f32
      %59 = vector.broadcast %cst_38 : f32 to vector<8x128xf32>
      %60 = arith.addf %59, %58 : vector<8x128xf32>
      %61 = arith.divf %59, %60 : vector<8x128xf32>
      %62 = vector.extract_strided_slice %55 {offsets = [0, 128], sizes = [8, 128], strides = [1, 1]} : vector<8x512xf32> to vector<8x128xf32>
      %63 = arith.negf %62 : vector<8x128xf32>
      %64 = math.exp %63 : vector<8x128xf32>
      %cst_39 = arith.constant 1.000000e+00 : f32
      %65 = vector.broadcast %cst_39 : f32 to vector<8x128xf32>
      %66 = arith.addf %65, %64 : vector<8x128xf32>
      %67 = arith.divf %65, %66 : vector<8x128xf32>
      %68 = vector.extract_strided_slice %55 {offsets = [0, 256], sizes = [8, 128], strides = [1, 1]} : vector<8x512xf32> to vector<8x128xf32>
      %69 = math.tanh %68 : vector<8x128xf32>
      %70 = vector.extract_strided_slice %55 {offsets = [0, 384], sizes = [8, 128], strides = [1, 1]} : vector<8x512xf32> to vector<8x128xf32>
      %71 = arith.negf %70 : vector<8x128xf32>
      %72 = math.exp %71 : vector<8x128xf32>
      %cst_40 = arith.constant 1.000000e+00 : f32
      %73 = vector.broadcast %cst_40 : f32 to vector<8x128xf32>
      %74 = arith.addf %73, %72 : vector<8x128xf32>
      %75 = arith.divf %73, %74 : vector<8x128xf32>
      %c0_41 = arith.constant 0 : index
      %c0_42 = arith.constant 0 : index
      %76 = vector.load %arg10[%c0_41, %c0_42] : memref<8x128xf32, #tpu.memory_space<vmem>>, vector<8x128xf32>
      %77 = arith.mulf %67, %76 : vector<8x128xf32>
      %78 = arith.mulf %61, %69 : vector<8x128xf32>
      %79 = arith.addf %77, %78 : vector<8x128xf32>
      %80 = math.tanh %79 : vector<8x128xf32>
      %81 = arith.mulf %75, %80 : vector<8x128xf32>
      %c0_43 = arith.constant 0 : index
      %c0_44 = arith.constant 0 : index
      %82 = vector.load %arg10[%c0_43, %c0_44] : memref<8x128xf32, #tpu.memory_space<vmem>>, vector<8x128xf32>
      tpu.vector_store %arg10[%c0_43, %c0_44], %79 {strides = array<i32>} : memref<8x128xf32, #tpu.memory_space<vmem>>, vector<8x128xf32>,
      %c0_45 = arith.constant 0 : index
      %c0_46 = arith.constant 0 : index
      %83 = vector.load %arg9[%c0_45, %c0_46] : memref<8x128xf32, #tpu.memory_space<vmem>>, vector<8x128xf32>
      tpu.vector_store %arg9[%c0_45, %c0_46], %81 {strides = array<i32>} : memref<8x128xf32, #tpu.memory_space<vmem>>, vector<8x128xf32>,
      %c5 = arith.constant 5 : index
      %c0_47 = arith.constant 0 : index
      %c0_48 = arith.constant 0 : index
      %84 = vector.load %arg5[%c5, %c0_47, %c0_48] : memref<8x8x128xf32, #tpu.memory_space<vmem>>, vector<1x8x128xf32>
      %85 = vector.shape_cast %84 : vector<1x8x128xf32> to vector<8x128xf32>
      %86 = vector.shape_cast %81 : vector<8x128xf32> to vector<1x8x128xf32>
      tpu.vector_store %arg5[%c5, %c0_47, %c0_48], %86 {strides = array<i32>} : memref<8x8x128xf32, #tpu.memory_space<vmem>>, vector<1x8x128xf32>,
    } else {
    }
    %c8_i32_26 = arith.constant 8 : i32
    %40 = arith.muli %arg0, %c8_i32_26 : i32
    %c6_i32 = arith.constant 6 : i32
    %41 = arith.addi %40, %c6_i32 : i32
    %c8_i32_27 = arith.constant 8 : i32
    %42 = arith.cmpi slt, %41, %c8_i32_27 : i32
    %43 = arith.extui %42 : i1 to i32
    %c0_i32_28 = arith.constant 0 : i32
    %44 = arith.cmpi ne, %43, %c0_i32_28 : i32
    scf.if %44 {
      %c48 = arith.constant 48 : index
      %c0_32 = arith.constant 0 : index
      %50 = vector.load %arg8[%c48, %c0_32] : memref<64x512xf32, #tpu.memory_space<vmem>>, vector<8x512xf32>
      %c0_33 = arith.constant 0 : index
      %c0_34 = arith.constant 0 : index
      %51 = vector.load %arg9[%c0_33, %c0_34] : memref<8x128xf32, #tpu.memory_space<vmem>>, vector<8x128xf32>
      %52 = arith.truncf %51 : vector<8x128xf32> to vector<8x128xbf16>
      %c0_35 = arith.constant 0 : index
      %c0_36 = arith.constant 0 : index
      %53 = vector.load %arg7[%c0_35, %c0_36] : memref<128x512xbf16, #tpu.memory_space<vmem>>, vector<128x512xbf16>
      %cst_37 = arith.constant dense<0.000000e+00> : vector<8x512xf32>
      %54 = tpu.matmul %52, %53, %cst_37 {dimension_numbers = #tpu.dot_dimension_numbers<[1], [0], [0], [1], [0, 0, 1, 1], [], []>} : vector<8x128xbf16>, vector<128x512xbf16>, vector<8x512xf32> -> vector<8x512xf32>
      %55 = arith.addf %50, %54 : vector<8x512xf32>
      %56 = vector.extract_strided_slice %55 {offsets = [0, 0], sizes = [8, 128], strides = [1, 1]} : vector<8x512xf32> to vector<8x128xf32>
      %57 = arith.negf %56 : vector<8x128xf32>
      %58 = math.exp %57 : vector<8x128xf32>
      %cst_38 = arith.constant 1.000000e+00 : f32
      %59 = vector.broadcast %cst_38 : f32 to vector<8x128xf32>
      %60 = arith.addf %59, %58 : vector<8x128xf32>
      %61 = arith.divf %59, %60 : vector<8x128xf32>
      %62 = vector.extract_strided_slice %55 {offsets = [0, 128], sizes = [8, 128], strides = [1, 1]} : vector<8x512xf32> to vector<8x128xf32>
      %63 = arith.negf %62 : vector<8x128xf32>
      %64 = math.exp %63 : vector<8x128xf32>
      %cst_39 = arith.constant 1.000000e+00 : f32
      %65 = vector.broadcast %cst_39 : f32 to vector<8x128xf32>
      %66 = arith.addf %65, %64 : vector<8x128xf32>
      %67 = arith.divf %65, %66 : vector<8x128xf32>
      %68 = vector.extract_strided_slice %55 {offsets = [0, 256], sizes = [8, 128], strides = [1, 1]} : vector<8x512xf32> to vector<8x128xf32>
      %69 = math.tanh %68 : vector<8x128xf32>
      %70 = vector.extract_strided_slice %55 {offsets = [0, 384], sizes = [8, 128], strides = [1, 1]} : vector<8x512xf32> to vector<8x128xf32>
      %71 = arith.negf %70 : vector<8x128xf32>
      %72 = math.exp %71 : vector<8x128xf32>
      %cst_40 = arith.constant 1.000000e+00 : f32
      %73 = vector.broadcast %cst_40 : f32 to vector<8x128xf32>
      %74 = arith.addf %73, %72 : vector<8x128xf32>
      %75 = arith.divf %73, %74 : vector<8x128xf32>
      %c0_41 = arith.constant 0 : index
      %c0_42 = arith.constant 0 : index
      %76 = vector.load %arg10[%c0_41, %c0_42] : memref<8x128xf32, #tpu.memory_space<vmem>>, vector<8x128xf32>
      %77 = arith.mulf %67, %76 : vector<8x128xf32>
      %78 = arith.mulf %61, %69 : vector<8x128xf32>
      %79 = arith.addf %77, %78 : vector<8x128xf32>
      %80 = math.tanh %79 : vector<8x128xf32>
      %81 = arith.mulf %75, %80 : vector<8x128xf32>
      %c0_43 = arith.constant 0 : index
      %c0_44 = arith.constant 0 : index
      %82 = vector.load %arg10[%c0_43, %c0_44] : memref<8x128xf32, #tpu.memory_space<vmem>>, vector<8x128xf32>
      tpu.vector_store %arg10[%c0_43, %c0_44], %79 {strides = array<i32>} : memref<8x128xf32, #tpu.memory_space<vmem>>, vector<8x128xf32>,
      %c0_45 = arith.constant 0 : index
      %c0_46 = arith.constant 0 : index
      %83 = vector.load %arg9[%c0_45, %c0_46] : memref<8x128xf32, #tpu.memory_space<vmem>>, vector<8x128xf32>
      tpu.vector_store %arg9[%c0_45, %c0_46], %81 {strides = array<i32>} : memref<8x128xf32, #tpu.memory_space<vmem>>, vector<8x128xf32>,
      %c6 = arith.constant 6 : index
      %c0_47 = arith.constant 0 : index
      %c0_48 = arith.constant 0 : index
      %84 = vector.load %arg5[%c6, %c0_47, %c0_48] : memref<8x8x128xf32, #tpu.memory_space<vmem>>, vector<1x8x128xf32>
      %85 = vector.shape_cast %84 : vector<1x8x128xf32> to vector<8x128xf32>
      %86 = vector.shape_cast %81 : vector<8x128xf32> to vector<1x8x128xf32>
      tpu.vector_store %arg5[%c6, %c0_47, %c0_48], %86 {strides = array<i32>} : memref<8x8x128xf32, #tpu.memory_space<vmem>>, vector<1x8x128xf32>,
    } else {
    }
    %c8_i32_29 = arith.constant 8 : i32
    %45 = arith.muli %arg0, %c8_i32_29 : i32
    %c7_i32 = arith.constant 7 : i32
    %46 = arith.addi %45, %c7_i32 : i32
    %c8_i32_30 = arith.constant 8 : i32
    %47 = arith.cmpi slt, %46, %c8_i32_30 : i32
    %48 = arith.extui %47 : i1 to i32
    %c0_i32_31 = arith.constant 0 : i32
    %49 = arith.cmpi ne, %48, %c0_i32_31 : i32
    scf.if %49 {
      %c56 = arith.constant 56 : index
      %c0_32 = arith.constant 0 : index
      %50 = vector.load %arg8[%c56, %c0_32] : memref<64x512xf32, #tpu.memory_space<vmem>>, vector<8x512xf32>
      %c0_33 = arith.constant 0 : index
      %c0_34 = arith.constant 0 : index
      %51 = vector.load %arg9[%c0_33, %c0_34] : memref<8x128xf32, #tpu.memory_space<vmem>>, vector<8x128xf32>
      %52 = arith.truncf %51 : vector<8x128xf32> to vector<8x128xbf16>
      %c0_35 = arith.constant 0 : index
      %c0_36 = arith.constant 0 : index
      %53 = vector.load %arg7[%c0_35, %c0_36] : memref<128x512xbf16, #tpu.memory_space<vmem>>, vector<128x512xbf16>
      %cst_37 = arith.constant dense<0.000000e+00> : vector<8x512xf32>
      %54 = tpu.matmul %52, %53, %cst_37 {dimension_numbers = #tpu.dot_dimension_numbers<[1], [0], [0], [1], [0, 0, 1, 1], [], []>} : vector<8x128xbf16>, vector<128x512xbf16>, vector<8x512xf32> -> vector<8x512xf32>
      %55 = arith.addf %50, %54 : vector<8x512xf32>
      %56 = vector.extract_strided_slice %55 {offsets = [0, 0], sizes = [8, 128], strides = [1, 1]} : vector<8x512xf32> to vector<8x128xf32>
      %57 = arith.negf %56 : vector<8x128xf32>
      %58 = math.exp %57 : vector<8x128xf32>
      %cst_38 = arith.constant 1.000000e+00 : f32
      %59 = vector.broadcast %cst_38 : f32 to vector<8x128xf32>
      %60 = arith.addf %59, %58 : vector<8x128xf32>
      %61 = arith.divf %59, %60 : vector<8x128xf32>
      %62 = vector.extract_strided_slice %55 {offsets = [0, 128], sizes = [8, 128], strides = [1, 1]} : vector<8x512xf32> to vector<8x128xf32>
      %63 = arith.negf %62 : vector<8x128xf32>
      %64 = math.exp %63 : vector<8x128xf32>
      %cst_39 = arith.constant 1.000000e+00 : f32
      %65 = vector.broadcast %cst_39 : f32 to vector<8x128xf32>
      %66 = arith.addf %65, %64 : vector<8x128xf32>
      %67 = arith.divf %65, %66 : vector<8x128xf32>
      %68 = vector.extract_strided_slice %55 {offsets = [0, 256], sizes = [8, 128], strides = [1, 1]} : vector<8x512xf32> to vector<8x128xf32>
      %69 = math.tanh %68 : vector<8x128xf32>
      %70 = vector.extract_strided_slice %55 {offsets = [0, 384], sizes = [8, 128], strides = [1, 1]} : vector<8x512xf32> to vector<8x128xf32>
      %71 = arith.negf %70 : vector<8x128xf32>
      %72 = math.exp %71 : vector<8x128xf32>
      %cst_40 = arith.constant 1.000000e+00 : f32
      %73 = vector.broadcast %cst_40 : f32 to vector<8x128xf32>
      %74 = arith.addf %73, %72 : vector<8x128xf32>
      %75 = arith.divf %73, %74 : vector<8x128xf32>
      %c0_41 = arith.constant 0 : index
      %c0_42 = arith.constant 0 : index
      %76 = vector.load %arg10[%c0_41, %c0_42] : memref<8x128xf32, #tpu.memory_space<vmem>>, vector<8x128xf32>
      %77 = arith.mulf %67, %76 : vector<8x128xf32>
      %78 = arith.mulf %61, %69 : vector<8x128xf32>
      %79 = arith.addf %77, %78 : vector<8x128xf32>
      %80 = math.tanh %79 : vector<8x128xf32>
      %81 = arith.mulf %75, %80 : vector<8x128xf32>
      %c0_43 = arith.constant 0 : index
      %c0_44 = arith.constant 0 : index
      %82 = vector.load %arg10[%c0_43, %c0_44] : memref<8x128xf32, #tpu.memory_space<vmem>>, vector<8x128xf32>
      tpu.vector_store %arg10[%c0_43, %c0_44], %79 {strides = array<i32>} : memref<8x128xf32, #tpu.memory_space<vmem>>, vector<8x128xf32>,
      %c0_45 = arith.constant 0 : index
      %c0_46 = arith.constant 0 : index
      %83 = vector.load %arg9[%c0_45, %c0_46] : memref<8x128xf32, #tpu.memory_space<vmem>>, vector<8x128xf32>
      tpu.vector_store %arg9[%c0_45, %c0_46], %81 {strides = array<i32>} : memref<8x128xf32, #tpu.memory_space<vmem>>, vector<8x128xf32>,
      %c7 = arith.constant 7 : index
      %c0_47 = arith.constant 0 : index
      %c0_48 = arith.constant 0 : index
      %84 = vector.load %arg5[%c7, %c0_47, %c0_48] : memref<8x8x128xf32, #tpu.memory_space<vmem>>, vector<1x8x128xf32>
      %85 = vector.shape_cast %84 : vector<1x8x128xf32> to vector<8x128xf32>
      %86 = vector.shape_cast %81 : vector<8x128xf32> to vector<1x8x128xf32>
      tpu.vector_store %arg5[%c7, %c0_47, %c0_48], %86 {strides = array<i32>} : memref<8x8x128xf32, #tpu.memory_space<vmem>>, vector<1x8x128xf32>,
    } else {
    }
    return
  }
  func.func @transform_0(%arg0: i32) -> (i32, i32) {
    %c0_i32 = arith.constant 0 : i32
    %c0_i32_0 = arith.constant 0 : i32
    return %arg0, %c0_i32 : i32, i32
  }
  func.func @transform_1(%arg0: i32) -> (i32, i32) {
    %c0_i32 = arith.constant 0 : i32
    %c0_i32_0 = arith.constant 0 : i32
    %c0_i32_1 = arith.constant 0 : i32
    return %c0_i32, %c0_i32_0 : i32, i32
  }
  func.func @transform_4(%arg0: i32) -> (i32, i32, i32) {
    %c0_i32 = arith.constant 0 : i32
    %c0_i32_0 = arith.constant 0 : i32
    %c0_i32_1 = arith.constant 0 : i32
    return %arg0, %c0_i32, %c0_i32_0 : i32, i32, i32
  }
}

</mosaic_0001>

<bundles_post_ra>
// kernel: _forward_impl.1
= control target key start
LH: loop header
LB: loop body
LE: loop exit
PB: predicated region body
PF: predicated region fallthrough
CT: control target
= control target key end

     0   :  { %s3682_s15 = smov [#allocation2]   ;;  %s3683_s17 = smov [#allocation3]   ;;  %s4304_s0 = inlined_call_operand.vmem [shape: bf16[64,128], index: 0, kind: input, shape index: {}]   ;;  %s4305_s1 = inlined_call_operand.vmem [shape: f32[1,512], index: 1, kind: input, shape index: {}]   ;;  %s4306_s2 = inlined_call_operand.hbm [shape: bf16[128,512], index: 2, kind: input, shape index: {}]   ;;  %s4307_s4 = inlined_call_operand.vmem [shape: f32[8,8,128], index: 4, kind: output, shape index: {}]   ;;  %s4308_s3 = inlined_call_operand.hbm [shape: bf16[128,512], index: 3, kind: input, shape index: {}]  }
   0x1   :  { %s25_s16 = sshll.u32 %s3682_s15, 4  ;;  %s37_s18 = sshll.u32 %s3683_s17, 4  ;;  %s26_s16 = int_to_ptr.vmem [resolvable:$true] %s25_s16  ;;  %s38_s18 = int_to_ptr.vmem [resolvable:$true] %s37_s18 }
   0x2   :  { %s3646_s19 = scalar_lea.vmem %s26_s16, 4096  ;;  %p3651_p1 = scmp.lt.s32.totalorder %s26_s16, %s26_s16 }
   0x3   :  { %p3647_p0 = scmp.ne.s32.totalorder %s26_s16, %s3646_s19  ;;  %p3652_p2 = scmp.lt.s32.totalorder %s3646_s19, %s3646_s19 }
   0x5   :  { %p3653_p3 = por %p3652_p2, %p3651_p1 }
   0x7   :  { %p3654_p4 = pnand %p3653_p3, %p3647_p0 }
   0x9   :  { %3657 = shalt.err (!%p3654_p4)  }
   0xa   :  { %28 = dma.hbm_to_vmem [thread:$0]  %s4306_s2, 4096, %s26_s16, [#allocation7] }
   0xb   :  { %s3666_s22 = scalar_lea.vmem %s38_s18, 4096  ;;  %p3671_p6 = scmp.lt.s32.totalorder %s38_s18, %s38_s18 }
   0xc   :  { %p3667_p5 = scmp.ne.s32.totalorder %s38_s18, %s3666_s22  ;;  %p3672_p7 = scmp.lt.s32.totalorder %s3666_s22, %s3666_s22 }
   0xe   :  { %p3673_p8 = por %p3672_p7, %p3671_p6 }
  0x10   :  { %p3674_p9 = pnand %p3673_p8, %p3667_p5 }
  0x12   :  { %3677 = shalt.err (!%p3674_p9)  }
  0x13   :  { %40 = dma.hbm_to_vmem [thread:$0]  %s4308_s3, 4096, %s38_s18, [#allocation7 + $0x1] }
  0x14   :  { %3678 = dma.done.wait [#allocation7], 4096 }
  0x15   :  { %3679 = vsyncadd [#allocation7], 4294963200 }
  0x16   :  { %3680 = dma.done.wait [#allocation7 + $0x1], 4096 }
  0x17   :  { %3681 = vsyncadd [#allocation7 + $0x1], 4294963200  ;;  %v4309_v0 = vmov 0   ;;  %v3362_v1 = vld [vmem:[#allocation2 + $0xe4] ss:$16 sps:$4 sm:$0xff]   ;;  %v3423_v44 = vld [vmem:[%s4304_s0 + $0x8] sm:$0xff]  }
  0x18   :  { %327 = vmatprep.mubr.bf16.mxu0 %v4309_v0  ;;  %400 = vmatprep.mubr.bf16.mxu1 %v4309_v0  ;;  %v3364_v2 = vld [vmem:[#allocation2 + $0xec] ss:$16 sps:$4 sm:$0xff]   ;;  %v3366_v3 = vld [vmem:[#allocation2 + $0xe0] ss:$16 sps:$4 sm:$0xff]   ;;  %v3367_v4 = vld [vmem:[#allocation2 + $0xe8] ss:$16 sps:$4 sm:$0xff]  }
  0x19   :  { %295 = vmatprep.subr.bf16.mxu0 %v3362_v1  ;;  %368 = vmatprep.subr.bf16.mxu1 %v3364_v2  ;;  %v3368_v5 = vld [vmem:[#allocation2 + $0xc4] ss:$16 sps:$4 sm:$0xff]   ;;  %v3370_v6 = vld [vmem:[#allocation2 + $0xcc] ss:$16 sps:$4 sm:$0xff]   ;;  %v3372_v7 = vld [vmem:[#allocation2 + $0xc0] ss:$16 sps:$4 sm:$0xff]  }
  0x1a   :  { %296 = vmatpush1.bf16.msra.mxu0 %v3366_v3  ;;  %369 = vmatpush1.bf16.msra.mxu1 %v3367_v4  ;;  %v3373_v8 = vld [vmem:[#allocation2 + $0xc8] ss:$16 sps:$4 sm:$0xff]   ;;  %v3374_v9 = vld [vmem:[#allocation2 + $0xa4] ss:$16 sps:$4 sm:$0xff]   ;;  %v3376_v10 = vld [vmem:[#allocation2 + $0xac] ss:$16 sps:$4 sm:$0xff]  }
  0x1b   :  { %297 = vmatprep.subr.bf16.mxu0 %v3368_v5  ;;  %370 = vmatprep.subr.bf16.mxu1 %v3370_v6  ;;  %v3378_v11 = vld [vmem:[#allocation2 + $0xa0] ss:$16 sps:$4 sm:$0xff]   ;;  %v3379_v12 = vld [vmem:[#allocation2 + $0xa8] ss:$16 sps:$4 sm:$0xff]   ;;  %v3380_v13 = vld [vmem:[#allocation2 + $0x84] ss:$16 sps:$4 sm:$0xff]  }
  0x1c   :  { %v3382_v14 = vld [vmem:[#allocation2 + $0x8c] ss:$16 sps:$4 sm:$0xff]   ;;  %v3384_v15 = vld [vmem:[#allocation2 + $0x80] ss:$16 sps:$4 sm:$0xff]   ;;  %v3385_v16 = vld [vmem:[#allocation2 + $0x88] ss:$16 sps:$4 sm:$0xff]  }
  0x1d   :  { %v3386_v17 = vld [vmem:[#allocation2 + $0x64] ss:$16 sps:$4 sm:$0xff]   ;;  %v3388_v18 = vld [vmem:[#allocation2 + $0x6c] ss:$16 sps:$4 sm:$0xff]   ;;  %v3390_v19 = vld [vmem:[#allocation2 + $0x60] ss:$16 sps:$4 sm:$0xff]  }
  0x1e   :  { %298 = vmatpush1.bf16.msra.mxu0 %v3372_v7  ;;  %371 = vmatpush1.bf16.msra.mxu1 %v3373_v8  ;;  %v3391_v20 = vld [vmem:[#allocation2 + $0x68] ss:$16 sps:$4 sm:$0xff]   ;;  %v3392_v21 = vld [vmem:[#allocation2 + $0x44] ss:$16 sps:$4 sm:$0xff]   ;;  %v3394_v22 = vld [vmem:[#allocation2 + $0x4c] ss:$16 sps:$4 sm:$0xff]   ;;  %v91_v7 = vlaneseq }
  0x1f   :  { %299 = vmatprep.subr.bf16.mxu0 %v3374_v9  ;;  %372 = vmatprep.subr.bf16.mxu1 %v3376_v10  ;;  %v3396_v23 = vld [vmem:[#allocation2 + $0x40] ss:$16 sps:$4 sm:$0xff]   ;;  %v3397_v24 = vld [vmem:[#allocation2 + $0x48] ss:$16 sps:$4 sm:$0xff]   ;;  %v3398_v25 = vld [vmem:[#allocation2 + $0x24] ss:$16 sps:$4 sm:$0xff]  }
  0x20   :  { %v3400_v26 = vld [vmem:[#allocation2 + $0x2c] ss:$16 sps:$4 sm:$0xff]   ;;  %v3402_v27 = vld [vmem:[#allocation2 + $0x20] ss:$16 sps:$4 sm:$0xff]   ;;  %v3403_v28 = vld [vmem:[#allocation2 + $0x28] ss:$16 sps:$4 sm:$0xff]  }
  0x21   :  { %v3404_v29 = vld [vmem:[#allocation2 + $0x4] ss:$16 sps:$4 sm:$0xff]   ;;  %v3406_v30 = vld [vmem:[#allocation2 + $0xc] ss:$16 sps:$4 sm:$0xff]   ;;  %v3408_v31 = vld [vmem:[#allocation2] ss:$16 sps:$4 sm:$0xff]  }
  0x22   :  { %300 = vmatpush1.bf16.msra.mxu0 %v3378_v11  ;;  %373 = vmatpush1.bf16.msra.mxu1 %v3379_v12  ;;  %v3409_v32 = vld [vmem:[#allocation2 + $0x8] ss:$16 sps:$4 sm:$0xff]   ;;  %v3719_v33 = vld [vmem:[#allocation3 + $0xe4] ss:$16 sps:$4 sm:$0xff]   ;;  %v3721_v34 = vld [vmem:[#allocation3 + $0xec] ss:$16 sps:$4 sm:$0xff]  }
  0x23   :  { %301 = vmatprep.subr.bf16.mxu0 %v3380_v13  ;;  %374 = vmatprep.subr.bf16.mxu1 %v3382_v14  ;;  %v3410_v35 = vld [vmem:[%s4304_s0] sm:$0xff]   ;;  %v3728_v37 = vld [vmem:[#allocation3 + $0xe8] ss:$16 sps:$4 sm:$0xff]   ;;  %v3734_v39 = vld [vmem:[#allocation3 + $0xcc] ss:$16 sps:$4 sm:$0xff]   ;;  %v3685_v6 = vmov 0.0|0.0  }
  0x24   :  { %v3726_v36 = vld [vmem:[#allocation3 + $0xe0] ss:$16 sps:$4 sm:$0xff]   ;;  %v3732_v38 = vld [vmem:[#allocation3 + $0xc4] ss:$16 sps:$4 sm:$0xff]   ;;  %v3740_v41 = vld [vmem:[#allocation3 + $0xc8] ss:$16 sps:$4 sm:$0xff]  }
  0x25   :  { %v3736_v40 = vld [vmem:[#allocation3 + $0xc0] ss:$16 sps:$4 sm:$0xff]   ;;  %v3744_v42 = vld [vmem:[#allocation3 + $0xa4] ss:$16 sps:$4 sm:$0xff]   ;;  %v3746_v43 = vld [vmem:[#allocation3 + $0xac] ss:$16 sps:$4 sm:$0xff]  }
  0x26   :  { %302 = vmatpush1.bf16.msra.mxu0 %v3384_v15  ;;  %375 = vmatpush1.bf16.msra.mxu1 %v3385_v16  ;;  %v3753_v45 = vld [vmem:[#allocation3 + $0xa0] ss:$16 sps:$4 sm:$0xff]   ;;  %v3755_v46 = vld [vmem:[#allocation3 + $0xa8] ss:$16 sps:$4 sm:$0xff]   ;;  %v3759_v47 = vld [vmem:[#allocation3 + $0x84] ss:$16 sps:$4 sm:$0xff]  }
  0x27   :  { %303 = vmatprep.subr.bf16.mxu0 %v3386_v17  ;;  %376 = vmatprep.subr.bf16.mxu1 %v3388_v18  ;;  %v3763_v48 = vld [vmem:[#allocation3 + $0x8c] ss:$16 sps:$4 sm:$0xff]   ;;  %v3765_v49 = vld [vmem:[#allocation3 + $0x80] ss:$16 sps:$4 sm:$0xff]   ;;  %v3767_v50 = vld [vmem:[#allocation3 + $0x88] ss:$16 sps:$4 sm:$0xff]  }
  0x28   :  { %v3771_v51 = vld [vmem:[#allocation3 + $0x64] ss:$16 sps:$4 sm:$0xff]   ;;  %v3775_v52 = vld [vmem:[#allocation3 + $0x6c] ss:$16 sps:$4 sm:$0xff]   ;;  %v3782_v54 = vld [vmem:[#allocation3 + $0x60] ss:$16 sps:$4 sm:$0xff]  }
  0x29   :  { %v3436_v53 = vld [vmem:[%s4304_s0 + $0x10] sm:$0xff]   ;;  %v3784_v55 = vld [vmem:[#allocation3 + $0x68] ss:$16 sps:$4 sm:$0xff]   ;;  %v3788_v57 = vld [vmem:[#allocation3 + $0x4c] ss:$16 sps:$4 sm:$0xff]   ;;  %v92_v8 = vshrl.u32 %v91_v7, 7 }
  0x2a   :  { %304 = vmatpush1.bf16.msra.mxu0 %v3390_v19  ;;  %377 = vmatpush1.bf16.msra.mxu1 %v3391_v20  ;;  %v3786_v56 = vld [vmem:[#allocation3 + $0x44] ss:$16 sps:$4 sm:$0xff]   ;;  %v3794_v58 = vld [vmem:[#allocation3 + $0x40] ss:$16 sps:$4 sm:$0xff]   ;;  %v3796_v59 = vld [vmem:[#allocation3 + $0x48] ss:$16 sps:$4 sm:$0xff]  }
  0x2b   :  { %305 = vmatprep.subr.bf16.mxu0 %v3392_v21  ;;  %378 = vmatprep.subr.bf16.mxu1 %v3394_v22  ;;  %v3798_v60 = vld [vmem:[#allocation3 + $0x24] ss:$16 sps:$4 sm:$0xff]   ;;  %v3800_v61 = vld [vmem:[#allocation3 + $0x2c] ss:$16 sps:$4 sm:$0xff]   ;;  %v3811_v63 = vld [vmem:[#allocation3 + $0x20] ss:$16 sps:$4 sm:$0xff]  }
  0x2c   :  { %v3449_v62 = vld [vmem:[%s4304_s0 + $0x18] sm:$0xff]   ;;  %v3815_v2 = vld [vmem:[#allocation3 + $0x4] ss:$16 sps:$4 sm:$0xff]   ;;  %v3825_v4 = vld [vmem:[#allocation3] ss:$16 sps:$4 sm:$0xff]   ;;  %v101_v9 = vsub.s32 2, %v92_v8 }
  0x2d   :  { %v3813_v1 = vld [vmem:[#allocation3 + $0x28] ss:$16 sps:$4 sm:$0xff]   ;;  %v3821_v3 = vld [vmem:[#allocation3 + $0xc] ss:$16 sps:$4 sm:$0xff]   ;;  %v93_v10 = vsub.s32 0, %v92_v8  ;;  %v105_v11 = vsub.s32 3, %v92_v8 }
  0x2e   :  { %306 = vmatpush1.bf16.msra.mxu0 %v3396_v23  ;;  %379 = vmatpush1.bf16.msra.mxu1 %v3397_v24  ;;  %v3827_v5 = vld [vmem:[#allocation3 + $0x8] ss:$16 sps:$4 sm:$0xff]   ;;  %v89_v12 = vld [vmem:[%s4305_s1] sm:$0xf]  ;;  %v97_v16 = vsub.s32 1, %v92_v8 }
  0x2f   :  { %307 = vmatprep.subr.bf16.mxu0 %v3398_v25  ;;  %380 = vmatprep.subr.bf16.mxu1 %v3400_v26  ;;  %v3878_v15 = vrot.slane %v89_v12, %v101_v9  ;;  %v94_v19 = vrot.slane %v89_v12, %v93_v10  ;;  %v3884_v20 = vrot.slane %v89_v12, %v105_v11 }
  0x30   :  { %v98_v23 = vrot.slane %v89_v12, %v97_v16 }
  0x32   :  { %308 = vmatpush1.bf16.msra.mxu0 %v3402_v27  ;;  %381 = vmatpush1.bf16.msra.mxu1 %v3403_v28 }
  0x33   :  { %309 = vmatprep.subr.bf16.mxu0 %v3404_v29  ;;  %382 = vmatprep.subr.bf16.mxu1 %v3406_v30 }
  0x36   :  { %310 = vmatpush1.bf16.msra.mxu0 %v3408_v31  ;;  %383 = vmatpush1.bf16.msra.mxu1 %v3409_v32 }
  0x37   :  { %676 = vmatprep.subr.bf16.mxu0 %v3719_v33  ;;  %717 = vmatprep.subr.bf16.mxu1 %v3721_v34 }
  0x39   :  { %328 = vmatmul.mubr.bf16.vlgmr.msra.gmra.mxu0 %v3410_v35  ;;  %401 = vmatmul.mubr.bf16.vlgmr.msra.gmra.mxu1 %v3410_v35 }
  0x3a   :  { %677 = vmatpush1.bf16.msra.mxu0 %v3726_v36  ;;  %718 = vmatpush1.bf16.msra.mxu1 %v3728_v37 }
  0x3b   :  { %678 = vmatprep.subr.bf16.mxu0 %v3732_v38  ;;  %719 = vmatprep.subr.bf16.mxu1 %v3734_v39 }
  0x3c   :  { %337 = vmatprep.mubr.bf16.mxu0 %v4309_v0  ;;  %410 = vmatprep.mubr.bf16.mxu1 %v4309_v0 }
  0x3e   :  { %679 = vmatpush1.bf16.msra.mxu0 %v3736_v40  ;;  %720 = vmatpush1.bf16.msra.mxu1 %v3740_v41 }
  0x3f   :  { %680 = vmatprep.subr.bf16.mxu0 %v3744_v42  ;;  %721 = vmatprep.subr.bf16.mxu1 %v3746_v43 }
  0x41   :  { %338 = vmatmul.mubr.bf16.gmra.mxu0 %v3423_v44  ;;  %411 = vmatmul.mubr.bf16.gmra.mxu1 %v3423_v44 }
  0x42   :  { %681 = vmatpush1.bf16.msra.mxu0 %v3753_v45  ;;  %722 = vmatpush1.bf16.msra.mxu1 %v3755_v46 }
  0x43   :  { %682 = vmatprep.subr.bf16.mxu0 %v3759_v47  ;;  %723 = vmatprep.subr.bf16.mxu1 %v3763_v48 }
  0x44   :  { %347 = vmatprep.mubr.bf16.mxu0 %v4309_v0  ;;  %420 = vmatprep.mubr.bf16.mxu1 %v4309_v0 }
  0x46   :  { %683 = vmatpush1.bf16.msra.mxu0 %v3765_v49  ;;  %724 = vmatpush1.bf16.msra.mxu1 %v3767_v50 }
  0x47   :  { %684 = vmatprep.subr.bf16.mxu0 %v3771_v51  ;;  %725 = vmatprep.subr.bf16.mxu1 %v3775_v52 }
  0x49   :  { %348 = vmatmul.mubr.bf16.gmra.mxu0 %v3436_v53  ;;  %421 = vmatmul.mubr.bf16.gmra.mxu1 %v3436_v53 }
  0x4a   :  { %685 = vmatpush1.bf16.msra.mxu0 %v3782_v54  ;;  %726 = vmatpush1.bf16.msra.mxu1 %v3784_v55 }
  0x4b   :  { %686 = vmatprep.subr.bf16.mxu0 %v3786_v56  ;;  %727 = vmatprep.subr.bf16.mxu1 %v3788_v57 }
  0x4c   :  { %357 = vmatprep.mubr.bf16.mxu0 %v4309_v0  ;;  %430 = vmatprep.mubr.bf16.mxu1 %v4309_v0 }
  0x4e   :  { %687 = vmatpush1.bf16.msra.mxu0 %v3794_v58  ;;  %728 = vmatpush1.bf16.msra.mxu1 %v3796_v59 }
  0x4f   :  { %688 = vmatprep.subr.bf16.mxu0 %v3798_v60  ;;  %729 = vmatprep.subr.bf16.mxu1 %v3800_v61 }
  0x51   :  { %358 = vmatmul.mubr.bf16.gmra.mxu0 %v3449_v62  ;;  %431 = vmatmul.mubr.bf16.gmra.mxu1 %v3449_v62 }
  0x52   :  { %689 = vmatpush1.bf16.msra.mxu0 %v3811_v63  ;;  %730 = vmatpush1.bf16.msra.mxu1 %v3813_v1 }
  0x53   :  { %690 = vmatprep.subr.bf16.mxu0 %v3815_v2  ;;  %731 = vmatprep.subr.bf16.mxu1 %v3821_v3 }
  0x54   :  { %708 = vmatprep.mubr.bf16.mxu0 %v4309_v0  ;;  %749 = vmatprep.mubr.bf16.mxu1 %v4309_v0 }
  0x56   :  { %691 = vmatpush1.bf16.msra.mxu0 %v3825_v4  ;;  %732 = vmatpush1.bf16.msra.mxu1 %v3827_v5 }
  0x57   :  { %993 = vmatprep.subr.bf16.mxu0 %v3719_v33  ;;  %1034 = vmatprep.subr.bf16.mxu1 %v3721_v34 }
  0x59   :  { %709 = vmatmul.mubr.bf16.vlgmr.msra.gmra.mxu0 %v3685_v6  ;;  %750 = vmatmul.mubr.bf16.vlgmr.msra.gmra.mxu1 %v3685_v6 }
  0x5a   :  { %994 = vmatpush1.bf16.msra.mxu0 %v3726_v36  ;;  %1035 = vmatpush1.bf16.msra.mxu1 %v3728_v37 }
  0x5b   :  { %995 = vmatprep.subr.bf16.mxu0 %v3732_v38  ;;  %1036 = vmatprep.subr.bf16.mxu1 %v3734_v39 }
  0x5c   :  { %1025 = vmatprep.mubr.bf16.mxu0 %v4309_v0  ;;  %1066 = vmatprep.mubr.bf16.mxu1 %v4309_v0 }
  0x5e   :  { %996 = vmatpush1.bf16.msra.mxu0 %v3736_v40  ;;  %1037 = vmatpush1.bf16.msra.mxu1 %v3740_v41 }
  0x5f   :  { %997 = vmatprep.subr.bf16.mxu0 %v3744_v42  ;;  %1038 = vmatprep.subr.bf16.mxu1 %v3746_v43 }
  0x62   :  { %998 = vmatpush1.bf16.msra.mxu0 %v3753_v45  ;;  %1039 = vmatpush1.bf16.msra.mxu1 %v3755_v46 }
  0x63   :  { %999 = vmatprep.subr.bf16.mxu0 %v3759_v47  ;;  %1040 = vmatprep.subr.bf16.mxu1 %v3763_v48 }
  0x66   :  { %1000 = vmatpush1.bf16.msra.mxu0 %v3765_v49  ;;  %1041 = vmatpush1.bf16.msra.mxu1 %v3767_v50 }
  0x67   :  { %1001 = vmatprep.subr.bf16.mxu0 %v3771_v51  ;;  %1042 = vmatprep.subr.bf16.mxu1 %v3775_v52 }
  0x6a   :  { %1002 = vmatpush1.bf16.msra.mxu0 %v3782_v54  ;;  %1043 = vmatpush1.bf16.msra.mxu1 %v3784_v55 }
  0x6b   :  { %1003 = vmatprep.subr.bf16.mxu0 %v3786_v56  ;;  %1044 = vmatprep.subr.bf16.mxu1 %v3788_v57 }
  0x6e   :  { %1004 = vmatpush1.bf16.msra.mxu0 %v3794_v58  ;;  %1045 = vmatpush1.bf16.msra.mxu1 %v3796_v59 }
  0x6f   :  { %1005 = vmatprep.subr.bf16.mxu0 %v3798_v60  ;;  %1046 = vmatprep.subr.bf16.mxu1 %v3800_v61 }
  0x72   :  { %1006 = vmatpush1.bf16.msra.mxu0 %v3811_v63  ;;  %1047 = vmatpush1.bf16.msra.mxu1 %v3813_v1 }
  0x73   :  { %1007 = vmatprep.subr.bf16.mxu0 %v3815_v2  ;;  %1048 = vmatprep.subr.bf16.mxu1 %v3821_v3 }
  0x76   :  { %1008 = vmatpush1.bf16.msra.mxu0 %v3825_v4  ;;  %1049 = vmatpush1.bf16.msra.mxu1 %v3827_v5 }
  0x77   :  { %1311 = vmatprep.subr.bf16.mxu0 %v3719_v33  ;;  %1352 = vmatprep.subr.bf16.mxu1 %v3721_v34 }
  0xf9   :  { %v3874_v13 = vpop.f32.mrf.mxu0  ;;  %v3876_v14 = vpop.f32.mrf.mxu1 }
  0xfb   :  { %v3880_v17 = vpop.f32.mrf.mxu0  ;;  %v3882_v18 = vpop.f32.mrf.mxu1 }
  0xfd   :  { %v333_v21 = vpop.f32.mrf.mxu0  ;;  %v406_v22 = vpop.f32.mrf.mxu1 }
  0xfe   :  { %v3886_v24 = vadd.f32 %v333_v21, %v94_v19  ;;  %v3889_v25 = vadd.f32 %v406_v22, %v3878_v15 }
  0xff   :  { %v335_v26 = vpop.f32.mrf.mxu0  ;;  %v408_v27 = vpop.f32.mrf.mxu1 }
 0x100   :  { %v3891_v28 = vadd.f32 %v335_v26, %v98_v23  ;;  %v3894_v29 = vadd.f32 %v408_v27, %v3884_v20 }
 0x101   :  { %v339_v30 = vpop.f32.mrf.mxu0  ;;  %v412_v31 = vpop.f32.mrf.mxu1 }
 0x102   :  { %v3896_v32 = vadd.f32 %v339_v30, %v94_v19  ;;  %v3899_v35 = vadd.f32 %v412_v31, %v3878_v15 }
 0x103   :  { %v341_v44 = vpop.f32.mrf.mxu0  ;;  %v414_v53 = vpop.f32.mrf.mxu1 }
 0x104   :  { %4311 = vst [vmem:[#allocation16_spill] sm:$0xff] %v3899_v35  ;;  %v3901_v62 = vadd.f32 %v341_v44, %v98_v23  ;;  %v3904_v6 = vadd.f32 %v414_v53, %v3884_v20 }
 0x105   :  { %v343_v7 = vpop.f32.mrf.mxu0  ;;  %v416_v8 = vpop.f32.mrf.mxu1 }
 0x106   :  { %v3906_v9 = vadd.f32 %v343_v7, %v94_v19  ;;  %v3909_v10 = vadd.f32 %v416_v8, %v3878_v15 }
 0x107   :  { %v345_v11 = vpop.f32.mrf.mxu0  ;;  %v418_v12 = vpop.f32.mrf.mxu1 }
 0x108   :  { %4312 = vst [vmem:[#allocation17_spill] sm:$0xff] %v3906_v9  ;;  %4313 = vst [vmem:[#allocation18_spill] sm:$0xff] %v3909_v10  ;;  %v3911_v16 = vadd.f32 %v345_v11, %v98_v23  ;;  %v3914_v21 = vadd.f32 %v418_v12, %v3884_v20 }
 0x109   :  { %v349_v22 = vpop.f32.mrf.mxu0  ;;  %v422_v26 = vpop.f32.mrf.mxu1 }
 0x10a   :  { %4314 = vst [vmem:[#allocation19_spill] sm:$0xff] %v3911_v16  ;;  %4315 = vst [vmem:[#allocation20_spill] sm:$0xff] %v3914_v21  ;;  %v3916_v27 = vadd.f32 %v349_v22, %v94_v19  ;;  %v3919_v30 = vadd.f32 %v422_v26, %v3878_v15 }
 0x10b   :  { %v351_v31 = vpop.f32.mrf.mxu0  ;;  %v424_v44 = vpop.f32.mrf.mxu1 }
 0x10c   :  { %4316 = vst [vmem:[#allocation21_spill] sm:$0xff] %v3916_v27  ;;  %4317 = vst [vmem:[#allocation22_spill] sm:$0xff] %v3919_v30  ;;  %v3921_v53 = vadd.f32 %v351_v31, %v98_v23  ;;  %v3924_v7 = vadd.f32 %v424_v44, %v3884_v20 }
 0x10d   :  { %v353_v8 = vpop.f32.mrf.mxu0  ;;  %v426_v11 = vpop.f32.mrf.mxu1 }
 0x10e   :  { %4318 = vst [vmem:[#allocation23_spill] sm:$0xff] %v3921_v53  ;;  %4319 = vst [vmem:[#allocation24_spill] sm:$0xff] %v3924_v7  ;;  %v3926_v0 = vadd.f32 %v353_v8, %v94_v19  ;;  %v3929_v12 = vadd.f32 %v426_v11, %v3878_v15 }
 0x10f   :  { %v355_v10 = vpop.f32.mrf.mxu0  ;;  %v428_v22 = vpop.f32.mrf.mxu1 }
 0x110   :  { %4320 = vst [vmem:[#allocation25_spill] sm:$0xff] %v3926_v0  ;;  %4321 = vst [vmem:[#allocation26_spill] sm:$0xff] %v3929_v12  ;;  %v3931_v27 = vadd.f32 %v355_v10, %v98_v23  ;;  %v3934_v26 = vadd.f32 %v428_v22, %v3884_v20 }
 0x111   :  { %v359_v30 = vpop.f32.mrf.mxu0  ;;  %v432_v31 = vpop.f32.mrf.mxu1 }
 0x112   :  { %4322 = vst [vmem:[#allocation27_spill] sm:$0xff] %v3931_v27  ;;  %4323 = vst [vmem:[#allocation28_spill] sm:$0xff] %v3934_v26  ;;  %v3936_v53 = vadd.f32 %v359_v30, %v94_v19  ;;  %v3939_v44 = vadd.f32 %v432_v31, %v3878_v15 }
 0x113   :  { %v361_v7 = vpop.f32.mrf.mxu0  ;;  %v434_v8 = vpop.f32.mrf.mxu1 }
 0x114   :  { %4324 = vst [vmem:[#allocation29_spill] sm:$0xff] %v3936_v53  ;;  %4325 = vst [vmem:[#allocation30_spill] sm:$0xff] %v3939_v44  ;;  %v3941_v0 = vadd.f32 %v361_v7, %v98_v23  ;;  %v3944_v11 = vadd.f32 %v434_v8, %v3884_v20  ;;  %v330_v53 = vadd.f32 %v3874_v13, %v94_v19 }
 0x115   :  { %v363_v12 = vpop.f32.mrf.mxu0  ;;  %v436_v10 = vpop.f32.mrf.mxu1  ;;  %v332_v8 = vadd.f32 %v3880_v17, %v98_v23 }
 0x116   :  { %4326 = vst [vmem:[#allocation31_spill] sm:$0xff] %v3941_v0  ;;  %4327 = vst [vmem:[#allocation32_spill] sm:$0xff] %v3944_v11  ;;  %v3946_v27 = vadd.f32 %v363_v12, %v94_v19  ;;  %v3949_v22 = vadd.f32 %v436_v10, %v3878_v15  ;;  %v405_v19 = vadd.f32 %v3882_v18, %v3884_v20 }
 0x117   :  { %v365_v26 = vpop.f32.mrf.mxu0  ;;  %v438_v30 = vpop.f32.mrf.mxu1 }
 0x118   :  { %4328 = vst [vmem:[#allocation33_spill] sm:$0xff] %v3946_v27  ;;  %4329 = vst [vmem:[#allocation34_spill] sm:$0xff] %v3949_v22  ;;  %v3952_v31 = vadd.f32 %v365_v26, %v98_v23  ;;  %v3955_v44 = vadd.f32 %v438_v30, %v3884_v20  ;;  %v403_v30 = vadd.f32 %v3876_v14, %v3878_v15 }
 0x119   :  { %v710_v7 = vpop.f32.mrf.mxu0  ;;  %v751_v0 = vpop.f32.mrf.mxu1 }
 0x11a   :  { %v758_v11 = vadd.f32 %v710_v7, %v330_v53  ;;  %v760_v53 = vadd.f32 %v751_v0, %v403_v30 }
 0x11b   :  { %v712_v21 = vpop.f32.mrf.mxu0  ;;  %v753_v12 = vpop.f32.mrf.mxu1 }
 0x11c   :  { %v3101_v27 = vmul.f32 -1.442695, %v758_v11  ;;  %v759_v16 = vadd.f32 %v712_v21, %v332_v8  ;;  %v761_v26 = vadd.f32 %v753_v12, %v405_v19 }
 0x11d   :  { %v714_v10 = vpop.f32.mrf.mxu0  ;;  %v755_v22 = vpop.f32.mrf.mxu1 }
 0x11e   :  { %3510 = vpow2.f32 %v3101_v27  ;;  %v3102_v9 = vmul.f32 -1.442695, %v759_v16  ;;  %v3103_v17 = vmul.f32 -1.442695, %v761_v26  ;;  %v4330_v10 = vmov 0  }
 0x11f   :  { %v715_v35 = vpop.f32.mrf.mxu0  ;;  %v756_v13 = vpop.f32.mrf.mxu1 }
 0x120   :  { %3512 = vpow2.f32 %v3102_v9 }
 0x121   :  { %3514 = vpow2.f32 %v3103_v17 }
 0x12b   :  { %v3511_v23 = vpop.eup %3510 }
 0x12c   :  { %v765_v7 = vadd.f32 1.0, %v3511_v23 }
 0x12d   :  { %v3513_v11 = vpop.eup %3512 }
 0x12e   :  { %3516 = vrcp.f32 %v765_v7  ;;  %v771_v21 = vadd.f32 1.0, %v3513_v11  ;;  %v3515_v35 = vpop.eup %3514 }
 0x12f   :  { %3518 = vtanh.f32 %v760_v53  ;;  %v778_v22 = vadd.f32 1.0, %v3515_v35 }
 0x130   :  { %3520 = vrcp.f32 %v771_v21 }
 0x131   :  { %3522 = vrcp.f32 %v778_v22 }
 0x13b   :  { %v3517_v16 = vpop.eup %3516 }
 0x13c   :  { %v3519_v9 = vpop.eup %3518 }
 0x13d   :  { %v3521_v27 = vpop.eup %3520  ;;  %v783_v20 = vmul.f32 %v3519_v9, %v3517_v16 }
 0x13e   :  { %v782_v18 = vmul.f32 0.0, %v3521_v27  ;;  %v3523_v0 = vpop.eup %3522 }
 0x140   :  { %v3962_v8 = vadd.f32 %v783_v20, %v782_v18 }
 0x142   :  { %3524 = vtanh.f32 %v3962_v8 }
 0x14f   :  { %v3525_v14 = vpop.eup %3524 }
 0x150   :  { %v786_v15 = vmul.f32 %v3525_v14, %v3523_v0 }
 0x152   :  { %789 = vst [vmem:[%s4307_s4] sm:$0xff] %v786_v15  ;;  %v800_v12 = vpack.c.bf16 %v786_v15, %v786_v15 }
 0x154   :  { %1026 = vmatmul.mubr.bf16.vlgmr.msra.gmra.mxu0 %v800_v12  ;;  %1067 = vmatmul.mubr.bf16.vlgmr.msra.gmra.mxu1 %v800_v12 }
 0x155   :  { %1312 = vmatpush1.bf16.msra.mxu0 %v3726_v36  ;;  %1353 = vmatpush1.bf16.msra.mxu1 %v3728_v37 }
 0x156   :  { %1313 = vmatprep.subr.bf16.mxu0 %v3732_v38  ;;  %1354 = vmatprep.subr.bf16.mxu1 %v3734_v39 }
 0x157   :  { %1343 = vmatprep.mubr.bf16.mxu0 %v4330_v10  ;;  %1384 = vmatprep.mubr.bf16.mxu1 %v4330_v10 }
 0x159   :  { %1314 = vmatpush1.bf16.msra.mxu0 %v3736_v40  ;;  %1355 = vmatpush1.bf16.msra.mxu1 %v3740_v41 }
 0x15a   :  { %1315 = vmatprep.subr.bf16.mxu0 %v3744_v42  ;;  %1356 = vmatprep.subr.bf16.mxu1 %v3746_v43 }
 0x15d   :  { %1316 = vmatpush1.bf16.msra.mxu0 %v3753_v45  ;;  %1357 = vmatpush1.bf16.msra.mxu1 %v3755_v46 }
 0x15e   :  { %1317 = vmatprep.subr.bf16.mxu0 %v3759_v47  ;;  %1358 = vmatprep.subr.bf16.mxu1 %v3763_v48 }
 0x161   :  { %1318 = vmatpush1.bf16.msra.mxu0 %v3765_v49  ;;  %1359 = vmatpush1.bf16.msra.mxu1 %v3767_v50 }
 0x162   :  { %1319 = vmatprep.subr.bf16.mxu0 %v3771_v51  ;;  %1360 = vmatprep.subr.bf16.mxu1 %v3775_v52 }
 0x165   :  { %1320 = vmatpush1.bf16.msra.mxu0 %v3782_v54  ;;  %1361 = vmatpush1.bf16.msra.mxu1 %v3784_v55 }
 0x166   :  { %1321 = vmatprep.subr.bf16.mxu0 %v3786_v56  ;;  %1362 = vmatprep.subr.bf16.mxu1 %v3788_v57 }
 0x169   :  { %1322 = vmatpush1.bf16.msra.mxu0 %v3794_v58  ;;  %1363 = vmatpush1.bf16.msra.mxu1 %v3796_v59 }
 0x16a   :  { %1323 = vmatprep.subr.bf16.mxu0 %v3798_v60  ;;  %1364 = vmatprep.subr.bf16.mxu1 %v3800_v61 }
 0x16d   :  { %1324 = vmatpush1.bf16.msra.mxu0 %v3811_v63  ;;  %1365 = vmatpush1.bf16.msra.mxu1 %v3813_v1 }
 0x16e   :  { %1325 = vmatprep.subr.bf16.mxu0 %v3815_v2  ;;  %1366 = vmatprep.subr.bf16.mxu1 %v3821_v3 }
 0x171   :  { %1326 = vmatpush1.bf16.msra.mxu0 %v3825_v4  ;;  %1367 = vmatpush1.bf16.msra.mxu1 %v3827_v5 }
 0x172   :  { %1629 = vmatprep.subr.bf16.mxu0 %v3719_v33  ;;  %1670 = vmatprep.subr.bf16.mxu1 %v3721_v34 }
 0x214   :  { %v1027_v13 = vpop.f32.mrf.mxu0  ;;  %v1068_v19 = vpop.f32.mrf.mxu1 }
 0x215   :  { %v1075_v26 = vadd.f32 %v1027_v13, %v3886_v24  ;;  %v1077_v34 = vadd.f32 %v1068_v19, %v3889_v25 }
 0x216   :  { %v1029_v30 = vpop.f32.mrf.mxu0  ;;  %v1070_v17 = vpop.f32.mrf.mxu1 }
 0x217   :  { %v3136_v23 = vmul.f32 -1.442695, %v1075_v26  ;;  %v1076_v53 = vadd.f32 %v1029_v30, %v3891_v28  ;;  %v1078_v33 = vadd.f32 %v1070_v17, %v3894_v29  ;;  %v4062_v17 = vld [vmem:[#allocation3 + $0xe0] ss:$16 sps:$4 sm:$0xff]  }
 0x218   :  { %v1031_v7 = vpop.f32.mrf.mxu0  ;;  %v1072_v11 = vpop.f32.mrf.mxu1 }
 0x219   :  { %3526 = vpow2.f32 %v3136_v23  ;;  %v3137_v21 = vmul.f32 -1.442695, %v1076_v53  ;;  %v3138_v9 = vmul.f32 -1.442695, %v1078_v33  ;;  %v4064_v23 = vld [vmem:[#allocation3 + $0xe8] ss:$16 sps:$4 sm:$0xff]  }
 0x21a   :  { %v1032_v35 = vpop.f32.mrf.mxu0  ;;  %v1073_v16 = vpop.f32.mrf.mxu1  ;;  %v4070_v53 = vld [vmem:[#allocation3 + $0xc4] ss:$16 sps:$4 sm:$0xff]   ;;  %v4072_v7 = vld [vmem:[#allocation3 + $0xcc] ss:$16 sps:$4 sm:$0xff]   ;;  %v4074_v11 = vld [vmem:[#allocation3 + $0xc0] ss:$16 sps:$4 sm:$0xff]  }
 0x21b   :  { %3528 = vpow2.f32 %v3137_v21  ;;  %v4076_v21 = vld [vmem:[#allocation3 + $0xc8] ss:$16 sps:$4 sm:$0xff]   ;;  %v4082_v35 = vld [vmem:[#allocation3 + $0xa4] ss:$16 sps:$4 sm:$0xff]   ;;  %v4084_v16 = vld [vmem:[#allocation3 + $0xac] ss:$16 sps:$4 sm:$0xff]  }
 0x21c   :  { %3530 = vtanh.f32 %v1077_v34  ;;  %v4086_v33 = vld [vmem:[#allocation3 + $0xa0] ss:$16 sps:$4 sm:$0xff]   ;;  %v4088_v34 = vld [vmem:[#allocation3 + $0xa8] ss:$16 sps:$4 sm:$0xff]  }
 0x21d   :  { %3532 = vpow2.f32 %v3138_v9  ;;  %v4094_v9 = vld [vmem:[#allocation3 + $0x84] ss:$16 sps:$4 sm:$0xff]  }
 0x226   :  { %v3527_v27 = vpop.eup %3526 }
 0x227   :  { %v1082_v22 = vadd.f32 1.0, %v3527_v27  ;;  %v4096_v27 = vld [vmem:[#allocation3 + $0x8c] ss:$16 sps:$4 sm:$0xff]  }
 0x228   :  { %v3529_v24 = vpop.eup %3528 }
 0x229   :  { %3534 = vrcp.f32 %v1082_v22  ;;  %v1088_v18 = vadd.f32 1.0, %v3529_v24  ;;  %v3531_v28 = vpop.eup %3530  ;;  %v4098_v22 = vld [vmem:[#allocation3 + $0x80] ss:$16 sps:$4 sm:$0xff]   ;;  %v4100_v24 = vld [vmem:[#allocation3 + $0x88] ss:$16 sps:$4 sm:$0xff]  }
 0x22a   :  { %v3533_v20 = vpop.eup %3532 }
 0x22b   :  { %3536 = vrcp.f32 %v1088_v18  ;;  %v1095_v12 = vadd.f32 1.0, %v3533_v20  ;;  %v4104_v18 = vld [vmem:[#allocation3 + $0x64] ss:$16 sps:$4 sm:$0xff]   ;;  %v4110_v20 = vld [vmem:[#allocation3 + $0x60] ss:$16 sps:$4 sm:$0xff]  }
 0x22d   :  { %3538 = vrcp.f32 %v1095_v12  ;;  %v4122_v12 = vld [vmem:[#allocation3 + $0x40] ss:$16 sps:$4 sm:$0xff]  }
 0x236   :  { %v3535_v0 = vpop.eup %3534 }
 0x237   :  { %v1100_v14 = vmul.f32 %v3535_v0, %v3531_v28  ;;  %v4106_v28 = vld [vmem:[#allocation3 + $0x6c] ss:$16 sps:$4 sm:$0xff]   ;;  %v4112_v0 = vld [vmem:[#allocation3 + $0x68] ss:$16 sps:$4 sm:$0xff]  }
 0x238   :  { %v3537_v15 = vpop.eup %3536 }
 0x239   :  { %v1099_v13 = vmul.f32 %v3537_v15, %v3962_v8  ;;  %v4060_v8 = vld [vmem:[#allocation3 + $0xec] ss:$16 sps:$4 sm:$0xff]  }
 0x23a   :  { %v3539_v25 = vpop.eup %3538  ;;  %v4118_v15 = vld [vmem:[#allocation3 + $0x4c] ss:$16 sps:$4 sm:$0xff]  }
 0x23b   :  { %v4007_v29 = vadd.f32 %v1100_v14, %v1099_v13  ;;  %v4116_v14 = vld [vmem:[#allocation3 + $0x44] ss:$16 sps:$4 sm:$0xff]   ;;  %v4124_v13 = vld [vmem:[#allocation3 + $0x48] ss:$16 sps:$4 sm:$0xff]  }
 0x23d   :  { %3540 = vtanh.f32 %v4007_v29 }
 0x24a   :  { %v3541_v19 = vpop.eup %3540 }
 0x24b   :  { %v1103_v26 = vmul.f32 %v3541_v19, %v3539_v25  ;;  %v4130_v25 = vld [vmem:[#allocation3 + $0x2c] ss:$16 sps:$4 sm:$0xff]   ;;  %v4134_v19 = vld [vmem:[#allocation3 + $0x20] ss:$16 sps:$4 sm:$0xff]  }
 0x24d   :  { %3139 = vst [vmem:[%s4307_s4 + $0x8] sm:$0xff] %v1103_v26  ;;  %v1118_v30 = vpack.c.bf16 %v1103_v26, %v1103_v26  ;;  %v4136_v26 = vld [vmem:[#allocation3 + $0x28] ss:$16 sps:$4 sm:$0xff]  }
 0x24f   :  { %1344 = vmatmul.mubr.bf16.vlgmr.msra.gmra.mxu0 %v1118_v30  ;;  %1385 = vmatmul.mubr.bf16.vlgmr.msra.gmra.mxu1 %v1118_v30  ;;  %v4140_v30 = vld [vmem:[#allocation3 + $0x4] ss:$16 sps:$4 sm:$0xff]  }
 0x250   :  { %1630 = vmatpush1.bf16.msra.mxu0 %v3726_v36  ;;  %1671 = vmatpush1.bf16.msra.mxu1 %v3728_v37 }
 0x251   :  { %1631 = vmatprep.subr.bf16.mxu0 %v3732_v38  ;;  %1672 = vmatprep.subr.bf16.mxu1 %v3734_v39 }
 0x252   :  { %1661 = vmatprep.mubr.bf16.mxu0 %v4330_v10  ;;  %1702 = vmatprep.mubr.bf16.mxu1 %v4330_v10 }
 0x254   :  { %1632 = vmatpush1.bf16.msra.mxu0 %v3736_v40  ;;  %1673 = vmatpush1.bf16.msra.mxu1 %v3740_v41 }
 0x255   :  { %1633 = vmatprep.subr.bf16.mxu0 %v3744_v42  ;;  %1674 = vmatprep.subr.bf16.mxu1 %v3746_v43 }
 0x258   :  { %1634 = vmatpush1.bf16.msra.mxu0 %v3753_v45  ;;  %1675 = vmatpush1.bf16.msra.mxu1 %v3755_v46 }
 0x259   :  { %1635 = vmatprep.subr.bf16.mxu0 %v3759_v47  ;;  %1676 = vmatprep.subr.bf16.mxu1 %v3763_v48 }
 0x25c   :  { %1636 = vmatpush1.bf16.msra.mxu0 %v3765_v49  ;;  %1677 = vmatpush1.bf16.msra.mxu1 %v3767_v50  ;;  %v4331_v50 = vld [vmem:[#allocation16_spill] sm:$0xff] }
 0x25d   :  { %1637 = vmatprep.subr.bf16.mxu0 %v3771_v51  ;;  %1678 = vmatprep.subr.bf16.mxu1 %v3775_v52 }
 0x260   :  { %1638 = vmatpush1.bf16.msra.mxu0 %v3782_v54  ;;  %1679 = vmatpush1.bf16.msra.mxu1 %v3784_v55 }
 0x261   :  { %1639 = vmatprep.subr.bf16.mxu0 %v3786_v56  ;;  %1680 = vmatprep.subr.bf16.mxu1 %v3788_v57 }
 0x264   :  { %1640 = vmatpush1.bf16.msra.mxu0 %v3794_v58  ;;  %1681 = vmatpush1.bf16.msra.mxu1 %v3796_v59 }
 0x265   :  { %1641 = vmatprep.subr.bf16.mxu0 %v3798_v60  ;;  %1682 = vmatprep.subr.bf16.mxu1 %v3800_v61 }
 0x268   :  { %1642 = vmatpush1.bf16.msra.mxu0 %v3811_v63  ;;  %1683 = vmatpush1.bf16.msra.mxu1 %v3813_v1 }
 0x269   :  { %1643 = vmatprep.subr.bf16.mxu0 %v3815_v2  ;;  %1684 = vmatprep.subr.bf16.mxu1 %v3821_v3 }
 0x26c   :  { %1644 = vmatpush1.bf16.msra.mxu0 %v3825_v4  ;;  %1685 = vmatpush1.bf16.msra.mxu1 %v3827_v5 }
 0x26d   :  { %1988 = vmatprep.subr.bf16.mxu1 %v4060_v8 }
 0x30f   :  { %v1345_v36 = vpop.f32.mrf.mxu0  ;;  %v1386_v37 = vpop.f32.mrf.mxu1 }
 0x310   :  { %v1393_v38 = vadd.f32 %v1345_v36, %v3896_v32  ;;  %v1395_v51 = vadd.f32 %v1386_v37, %v4331_v50  ;;  %v4142_v36 = vld [vmem:[#allocation3 + $0xc] ss:$16 sps:$4 sm:$0xff]   ;;  %v4146_v37 = vld [vmem:[#allocation3] ss:$16 sps:$4 sm:$0xff]  }
 0x311   :  { %v1347_v39 = vpop.f32.mrf.mxu0  ;;  %v1388_v40 = vpop.f32.mrf.mxu1 }
 0x312   :  { %v3172_v41 = vmul.f32 -1.442695, %v1393_v38  ;;  %v1394_v42 = vadd.f32 %v1347_v39, %v3901_v62  ;;  %v1396_v49 = vadd.f32 %v1388_v40, %v3904_v6  ;;  %v4058_v6 = vld [vmem:[#allocation3 + $0xe4] ss:$16 sps:$4 sm:$0xff]   ;;  %v4148_v38 = vld [vmem:[#allocation3 + $0x8] ss:$16 sps:$4 sm:$0xff]  }
 0x313   :  { %v1349_v43 = vpop.f32.mrf.mxu0  ;;  %v1390_v45 = vpop.f32.mrf.mxu1  ;;  %1947 = vmatprep.subr.bf16.mxu0 %v4058_v6 }
 0x314   :  { %3542 = vpow2.f32 %v3172_v41  ;;  %v3173_v46 = vmul.f32 -1.442695, %v1394_v42  ;;  %v3174_v52 = vmul.f32 -1.442695, %v1396_v49  ;;  %v4332_v41 = vld [vmem:[#allocation17_spill] sm:$0xff] }
 0x315   :  { %v1350_v47 = vpop.f32.mrf.mxu0  ;;  %v1391_v48 = vpop.f32.mrf.mxu1 }
 0x316   :  { %3544 = vpow2.f32 %v3173_v46  ;;  %v4333_v47 = vld [vmem:[#allocation19_spill] sm:$0xff] }
 0x317   :  { %3546 = vtanh.f32 %v1395_v51 }
 0x318   :  { %3548 = vpow2.f32 %v3174_v52 }
 0x321   :  { %v3543_v54 = vpop.eup %3542 }
 0x322   :  { %v1400_v55 = vadd.f32 1.0, %v3543_v54 }
 0x323   :  { %v3545_v56 = vpop.eup %3544 }
 0x324   :  { %3550 = vrcp.f32 %v1400_v55  ;;  %v1406_v57 = vadd.f32 1.0, %v3545_v56  ;;  %v3547_v58 = vpop.eup %3546  ;;  %v4334_v55 = vld [vmem:[#allocation20_spill] sm:$0xff] }
 0x325   :  { %v3549_v59 = vpop.eup %3548 }
 0x326   :  { %3552 = vrcp.f32 %v1406_v57  ;;  %v1413_v1 = vadd.f32 1.0, %v3549_v59  ;;  %v4335_v57 = vld [vmem:[#allocation18_spill] sm:$0xff] }
 0x328   :  { %3554 = vrcp.f32 %v1413_v1 }
 0x331   :  { %v3551_v60 = vpop.eup %3550 }
 0x332   :  { %v1418_v61 = vmul.f32 %v3551_v60, %v3547_v58 }
 0x333   :  { %v3553_v63 = vpop.eup %3552 }
 0x334   :  { %v1417_v2 = vmul.f32 %v3553_v63, %v4007_v29  ;;  %v4128_v29 = vld [vmem:[#allocation3 + $0x24] ss:$16 sps:$4 sm:$0xff]  }
 0x335   :  { %v3555_v4 = vpop.eup %3554 }
 0x336   :  { %v4050_v3 = vadd.f32 %v1418_v61, %v1417_v2 }
 0x338   :  { %3556 = vtanh.f32 %v4050_v3 }
 0x345   :  { %v3557_v5 = vpop.eup %3556 }
 0x346   :  { %v1421_v32 = vmul.f32 %v3557_v5, %v3555_v4 }
 0x348   :  { %3175 = vst [vmem:[%s4307_s4 + $0x10] sm:$0xff] %v1421_v32  ;;  %v1436_v62 = vpack.c.bf16 %v1421_v32, %v1421_v32 }
 0x34a   :  { %1662 = vmatmul.mubr.bf16.vlgmr.msra.gmra.mxu0 %v1436_v62  ;;  %1703 = vmatmul.mubr.bf16.vlgmr.msra.gmra.mxu1 %v1436_v62 }
 0x34b   :  { %1979 = vmatprep.mubr.bf16.mxu0 %v4330_v10  ;;  %2020 = vmatprep.mubr.bf16.mxu1 %v4330_v10 }
 0x34c   :  { %1948 = vmatpush1.bf16.msra.mxu0 %v4062_v17  ;;  %1989 = vmatpush1.bf16.msra.mxu1 %v4064_v23 }
 0x34d   :  { %1949 = vmatprep.subr.bf16.mxu0 %v4070_v53  ;;  %1990 = vmatprep.subr.bf16.mxu1 %v4072_v7 }
 0x350   :  { %1950 = vmatpush1.bf16.msra.mxu0 %v4074_v11  ;;  %1991 = vmatpush1.bf16.msra.mxu1 %v4076_v21 }
 0x351   :  { %1951 = vmatprep.subr.bf16.mxu0 %v4082_v35  ;;  %1992 = vmatprep.subr.bf16.mxu1 %v4084_v16 }
 0x354   :  { %1952 = vmatpush1.bf16.msra.mxu0 %v4086_v33  ;;  %1993 = vmatpush1.bf16.msra.mxu1 %v4088_v34 }
 0x355   :  { %1953 = vmatprep.subr.bf16.mxu0 %v4094_v9  ;;  %1994 = vmatprep.subr.bf16.mxu1 %v4096_v27 }
 0x358   :  { %1954 = vmatpush1.bf16.msra.mxu0 %v4098_v22  ;;  %1995 = vmatpush1.bf16.msra.mxu1 %v4100_v24 }
 0x359   :  { %1955 = vmatprep.subr.bf16.mxu0 %v4104_v18  ;;  %1996 = vmatprep.subr.bf16.mxu1 %v4106_v28 }
 0x35c   :  { %1956 = vmatpush1.bf16.msra.mxu0 %v4110_v20  ;;  %1997 = vmatpush1.bf16.msra.mxu1 %v4112_v0 }
 0x35d   :  { %1957 = vmatprep.subr.bf16.mxu0 %v4116_v14  ;;  %1998 = vmatprep.subr.bf16.mxu1 %v4118_v15 }
 0x360   :  { %1958 = vmatpush1.bf16.msra.mxu0 %v4122_v12  ;;  %1999 = vmatpush1.bf16.msra.mxu1 %v4124_v13 }
 0x361   :  { %1959 = vmatprep.subr.bf16.mxu0 %v4128_v29  ;;  %2000 = vmatprep.subr.bf16.mxu1 %v4130_v25 }
 0x364   :  { %1960 = vmatpush1.bf16.msra.mxu0 %v4134_v19  ;;  %2001 = vmatpush1.bf16.msra.mxu1 %v4136_v26 }
 0x365   :  { %1961 = vmatprep.subr.bf16.mxu0 %v4140_v30  ;;  %2002 = vmatprep.subr.bf16.mxu1 %v4142_v36 }
 0x368   :  { %1962 = vmatpush1.bf16.msra.mxu0 %v4146_v37  ;;  %2003 = vmatpush1.bf16.msra.mxu1 %v4148_v38 }
 0x369   :  { %2265 = vmatprep.subr.bf16.mxu0 %v4058_v6  ;;  %2306 = vmatprep.subr.bf16.mxu1 %v4060_v8 }
 0x40a   :  { %v1663_v39 = vpop.f32.mrf.mxu0  ;;  %v1704_v40 = vpop.f32.mrf.mxu1 }
 0x40b   :  { %v1711_v42 = vadd.f32 %v1663_v39, %v4332_v41  ;;  %v1713_v58 = vadd.f32 %v1704_v40, %v4335_v57 }
 0x40c   :  { %v1665_v43 = vpop.f32.mrf.mxu0  ;;  %v1706_v45 = vpop.f32.mrf.mxu1 }
 0x40d   :  { %v3208_v46 = vmul.f32 -1.442695, %v1711_v42  ;;  %v1712_v48 = vadd.f32 %v1665_v43, %v4333_v47  ;;  %v1714_v56 = vadd.f32 %v1706_v45, %v4334_v55 }
 0x40e   :  { %v1667_v49 = vpop.f32.mrf.mxu0  ;;  %v1708_v50 = vpop.f32.mrf.mxu1 }
 0x40f   :  { %3558 = vpow2.f32 %v3208_v46  ;;  %v3209_v51 = vmul.f32 -1.442695, %v1712_v48  ;;  %v3210_v59 = vmul.f32 -1.442695, %v1714_v56  ;;  %v4336_v48 = vld [vmem:[#allocation21_spill] sm:$0xff] }
 0x410   :  { %v1668_v52 = vpop.f32.mrf.mxu0  ;;  %v1709_v54 = vpop.f32.mrf.mxu1 }
 0x411   :  { %3560 = vpow2.f32 %v3209_v51  ;;  %v4337_v54 = vld [vmem:[#allocation23_spill] sm:$0xff] }
 0x412   :  { %3562 = vtanh.f32 %v1713_v58 }
 0x413   :  { %3564 = vpow2.f32 %v3210_v59 }
 0x41c   :  { %v3559_v60 = vpop.eup %3558 }
 0x41d   :  { %v1718_v61 = vadd.f32 1.0, %v3559_v60 }
 0x41e   :  { %v3561_v63 = vpop.eup %3560 }
 0x41f   :  { %3566 = vrcp.f32 %v1718_v61  ;;  %v1724_v1 = vadd.f32 1.0, %v3561_v63  ;;  %v3563_v2 = vpop.eup %3562  ;;  %v4338_v61 = vld [vmem:[#allocation24_spill] sm:$0xff] }
 0x420   :  { %v3565_v4 = vpop.eup %3564 }
 0x421   :  { %3568 = vrcp.f32 %v1724_v1  ;;  %v1731_v39 = vadd.f32 1.0, %v3565_v4  ;;  %v4339_v1 = vld [vmem:[#allocation22_spill] sm:$0xff] }
 0x423   :  { %3570 = vrcp.f32 %v1731_v39 }
 0x42c   :  { %v3567_v5 = vpop.eup %3566 }
 0x42d   :  { %v1736_v32 = vmul.f32 %v3567_v5, %v3563_v2 }
 0x42e   :  { %v3569_v62 = vpop.eup %3568 }
 0x42f   :  { %v1735_v41 = vmul.f32 %v3569_v62, %v4050_v3 }
 0x430   :  { %v3571_v40 = vpop.eup %3570 }
 0x431   :  { %v4161_v42 = vadd.f32 %v1736_v32, %v1735_v41 }
 0x433   :  { %3572 = vtanh.f32 %v4161_v42 }
 0x440   :  { %v3573_v43 = vpop.eup %3572 }
 0x441   :  { %v1739_v45 = vmul.f32 %v3573_v43, %v3571_v40 }
 0x443   :  { %3211 = vst [vmem:[%s4307_s4 + $0x18] sm:$0xff] %v1739_v45  ;;  %v1754_v46 = vpack.c.bf16 %v1739_v45, %v1739_v45 }
 0x445   :  { %1980 = vmatmul.mubr.bf16.vlgmr.msra.gmra.mxu0 %v1754_v46  ;;  %2021 = vmatmul.mubr.bf16.vlgmr.msra.gmra.mxu1 %v1754_v46 }
 0x446   :  { %2266 = vmatpush1.bf16.msra.mxu0 %v4062_v17  ;;  %2307 = vmatpush1.bf16.msra.mxu1 %v4064_v23 }
 0x447   :  { %2267 = vmatprep.subr.bf16.mxu0 %v4070_v53  ;;  %2308 = vmatprep.subr.bf16.mxu1 %v4072_v7 }
 0x448   :  { %2297 = vmatprep.mubr.bf16.mxu0 %v4330_v10  ;;  %2338 = vmatprep.mubr.bf16.mxu1 %v4330_v10 }
 0x44a   :  { %2268 = vmatpush1.bf16.msra.mxu0 %v4074_v11  ;;  %2309 = vmatpush1.bf16.msra.mxu1 %v4076_v21 }
 0x44b   :  { %2269 = vmatprep.subr.bf16.mxu0 %v4082_v35  ;;  %2310 = vmatprep.subr.bf16.mxu1 %v4084_v16 }
 0x44e   :  { %2270 = vmatpush1.bf16.msra.mxu0 %v4086_v33  ;;  %2311 = vmatpush1.bf16.msra.mxu1 %v4088_v34 }
 0x44f   :  { %2271 = vmatprep.subr.bf16.mxu0 %v4094_v9  ;;  %2312 = vmatprep.subr.bf16.mxu1 %v4096_v27 }
 0x452   :  { %2272 = vmatpush1.bf16.msra.mxu0 %v4098_v22  ;;  %2313 = vmatpush1.bf16.msra.mxu1 %v4100_v24 }
 0x453   :  { %2273 = vmatprep.subr.bf16.mxu0 %v4104_v18  ;;  %2314 = vmatprep.subr.bf16.mxu1 %v4106_v28 }
 0x456   :  { %2274 = vmatpush1.bf16.msra.mxu0 %v4110_v20  ;;  %2315 = vmatpush1.bf16.msra.mxu1 %v4112_v0 }
 0x457   :  { %2275 = vmatprep.subr.bf16.mxu0 %v4116_v14  ;;  %2316 = vmatprep.subr.bf16.mxu1 %v4118_v15 }
 0x45a   :  { %2276 = vmatpush1.bf16.msra.mxu0 %v4122_v12  ;;  %2317 = vmatpush1.bf16.msra.mxu1 %v4124_v13 }
 0x45b   :  { %2277 = vmatprep.subr.bf16.mxu0 %v4128_v29  ;;  %2318 = vmatprep.subr.bf16.mxu1 %v4130_v25 }
 0x45e   :  { %2278 = vmatpush1.bf16.msra.mxu0 %v4134_v19  ;;  %2319 = vmatpush1.bf16.msra.mxu1 %v4136_v26 }
 0x45f   :  { %2279 = vmatprep.subr.bf16.mxu0 %v4140_v30  ;;  %2320 = vmatprep.subr.bf16.mxu1 %v4142_v36 }
 0x462   :  { %2280 = vmatpush1.bf16.msra.mxu0 %v4146_v37  ;;  %2321 = vmatpush1.bf16.msra.mxu1 %v4148_v38 }
 0x463   :  { %2583 = vmatprep.subr.bf16.mxu0 %v4058_v6  ;;  %2624 = vmatprep.subr.bf16.mxu1 %v4060_v8 }
 0x505   :  { %v1981_v3 = vpop.f32.mrf.mxu0  ;;  %v2022_v47 = vpop.f32.mrf.mxu1 }
 0x506   :  { %v2029_v49 = vadd.f32 %v1981_v3, %v4336_v48  ;;  %v2031_v2 = vadd.f32 %v2022_v47, %v4339_v1 }
 0x507   :  { %v1983_v50 = vpop.f32.mrf.mxu0  ;;  %v2024_v51 = vpop.f32.mrf.mxu1 }
 0x508   :  { %v3244_v52 = vmul.f32 -1.442695, %v2029_v49  ;;  %v2030_v55 = vadd.f32 %v1983_v50, %v4337_v54  ;;  %v2032_v63 = vadd.f32 %v2024_v51, %v4338_v61 }
 0x509   :  { %v1985_v56 = vpop.f32.mrf.mxu0  ;;  %v2026_v57 = vpop.f32.mrf.mxu1 }
 0x50a   :  { %3574 = vpow2.f32 %v3244_v52  ;;  %v3245_v58 = vmul.f32 -1.442695, %v2030_v55  ;;  %v3246_v4 = vmul.f32 -1.442695, %v2032_v63  ;;  %v4340_v55 = vld [vmem:[#allocation25_spill] sm:$0xff] }
 0x50b   :  { %v1986_v59 = vpop.f32.mrf.mxu0  ;;  %v2027_v60 = vpop.f32.mrf.mxu1 }
 0x50c   :  { %3576 = vpow2.f32 %v3245_v58  ;;  %v4341_v60 = vld [vmem:[#allocation27_spill] sm:$0xff] }
 0x50d   :  { %3578 = vtanh.f32 %v2031_v2 }
 0x50e   :  { %3580 = vpow2.f32 %v3246_v4 }
 0x517   :  { %v3575_v5 = vpop.eup %3574 }
 0x518   :  { %v2036_v32 = vadd.f32 1.0, %v3575_v5 }
 0x519   :  { %v3577_v62 = vpop.eup %3576 }
 0x51a   :  { %3582 = vrcp.f32 %v2036_v32  ;;  %v2042_v39 = vadd.f32 1.0, %v3577_v62  ;;  %v3579_v41 = vpop.eup %3578  ;;  %v4342_v32 = vld [vmem:[#allocation28_spill] sm:$0xff]  ;;  %v4343_v62 = vld [vmem:[#allocation26_spill] sm:$0xff] }
 0x51b   :  { %v3581_v40 = vpop.eup %3580 }
 0x51c   :  { %3584 = vrcp.f32 %v2042_v39  ;;  %v2049_v3 = vadd.f32 1.0, %v3581_v40 }
 0x51e   :  { %3586 = vrcp.f32 %v2049_v3 }
 0x527   :  { %v3583_v43 = vpop.eup %3582 }
 0x528   :  { %v2054_v45 = vmul.f32 %v3583_v43, %v3579_v41 }
 0x529   :  { %v3585_v46 = vpop.eup %3584 }
 0x52a   :  { %v2053_v48 = vmul.f32 %v3585_v46, %v4161_v42 }
 0x52b   :  { %v3587_v47 = vpop.eup %3586 }
 0x52c   :  { %v4206_v49 = vadd.f32 %v2054_v45, %v2053_v48 }
 0x52e   :  { %3588 = vtanh.f32 %v4206_v49 }
 0x53b   :  { %v3589_v50 = vpop.eup %3588 }
 0x53c   :  { %v2057_v51 = vmul.f32 %v3589_v50, %v3587_v47 }
 0x53e   :  { %3247 = vst [vmem:[%s4307_s4 + $0x20] sm:$0xff] %v2057_v51  ;;  %v2072_v52 = vpack.c.bf16 %v2057_v51, %v2057_v51 }
 0x540   :  { %2298 = vmatmul.mubr.bf16.vlgmr.msra.gmra.mxu0 %v2072_v52  ;;  %2339 = vmatmul.mubr.bf16.vlgmr.msra.gmra.mxu1 %v2072_v52 }
 0x541   :  { %2584 = vmatpush1.bf16.msra.mxu0 %v4062_v17  ;;  %2625 = vmatpush1.bf16.msra.mxu1 %v4064_v23 }
 0x542   :  { %2585 = vmatprep.subr.bf16.mxu0 %v4070_v53  ;;  %2626 = vmatprep.subr.bf16.mxu1 %v4072_v7 }
 0x543   :  { %2615 = vmatprep.mubr.bf16.mxu0 %v4330_v10  ;;  %2656 = vmatprep.mubr.bf16.mxu1 %v4330_v10 }
 0x545   :  { %2586 = vmatpush1.bf16.msra.mxu0 %v4074_v11  ;;  %2627 = vmatpush1.bf16.msra.mxu1 %v4076_v21 }
 0x546   :  { %2587 = vmatprep.subr.bf16.mxu0 %v4082_v35  ;;  %2628 = vmatprep.subr.bf16.mxu1 %v4084_v16 }
 0x549   :  { %2588 = vmatpush1.bf16.msra.mxu0 %v4086_v33  ;;  %2629 = vmatpush1.bf16.msra.mxu1 %v4088_v34 }
 0x54a   :  { %2589 = vmatprep.subr.bf16.mxu0 %v4094_v9  ;;  %2630 = vmatprep.subr.bf16.mxu1 %v4096_v27 }
 0x54d   :  { %2590 = vmatpush1.bf16.msra.mxu0 %v4098_v22  ;;  %2631 = vmatpush1.bf16.msra.mxu1 %v4100_v24 }
 0x54e   :  { %2591 = vmatprep.subr.bf16.mxu0 %v4104_v18  ;;  %2632 = vmatprep.subr.bf16.mxu1 %v4106_v28 }
 0x551   :  { %2592 = vmatpush1.bf16.msra.mxu0 %v4110_v20  ;;  %2633 = vmatpush1.bf16.msra.mxu1 %v4112_v0 }
 0x552   :  { %2593 = vmatprep.subr.bf16.mxu0 %v4116_v14  ;;  %2634 = vmatprep.subr.bf16.mxu1 %v4118_v15 }
 0x555   :  { %2594 = vmatpush1.bf16.msra.mxu0 %v4122_v12  ;;  %2635 = vmatpush1.bf16.msra.mxu1 %v4124_v13 }
 0x556   :  { %2595 = vmatprep.subr.bf16.mxu0 %v4128_v29  ;;  %2636 = vmatprep.subr.bf16.mxu1 %v4130_v25 }
 0x559   :  { %2596 = vmatpush1.bf16.msra.mxu0 %v4134_v19  ;;  %2637 = vmatpush1.bf16.msra.mxu1 %v4136_v26 }
 0x55a   :  { %2597 = vmatprep.subr.bf16.mxu0 %v4140_v30  ;;  %2638 = vmatprep.subr.bf16.mxu1 %v4142_v36 }
 0x55d   :  { %2598 = vmatpush1.bf16.msra.mxu0 %v4146_v37  ;;  %2639 = vmatpush1.bf16.msra.mxu1 %v4148_v38 }
 0x55e   :  { %2901 = vmatprep.subr.bf16.mxu0 %v4058_v6  ;;  %2942 = vmatprep.subr.bf16.mxu1 %v4060_v8 }
 0x600   :  { %v2299_v42 = vpop.f32.mrf.mxu0  ;;  %v2340_v54 = vpop.f32.mrf.mxu1 }
 0x601   :  { %v2347_v56 = vadd.f32 %v2299_v42, %v4340_v55  ;;  %v2349_v8 = vadd.f32 %v2340_v54, %v4343_v62 }
 0x602   :  { %v2301_v57 = vpop.f32.mrf.mxu0  ;;  %v2342_v58 = vpop.f32.mrf.mxu1 }
 0x603   :  { %v3280_v59 = vmul.f32 -1.442695, %v2347_v56  ;;  %v2348_v61 = vadd.f32 %v2301_v57, %v4341_v60  ;;  %v2350_v6 = vadd.f32 %v2342_v58, %v4342_v32 }
 0x604   :  { %v2303_v63 = vpop.f32.mrf.mxu0  ;;  %v2344_v1 = vpop.f32.mrf.mxu1 }
 0x605   :  { %3590 = vpow2.f32 %v3280_v59  ;;  %v3281_v2 = vmul.f32 -1.442695, %v2348_v61  ;;  %v3282_v39 = vmul.f32 -1.442695, %v2350_v6  ;;  %v4348_v1 = vld [vmem:[#allocation33_spill] sm:$0xff] }
 0x606   :  { %v2304_v4 = vpop.f32.mrf.mxu0  ;;  %v2345_v5 = vpop.f32.mrf.mxu1 }
 0x607   :  { %3592 = vpow2.f32 %v3281_v2 }
 0x608   :  { %3594 = vtanh.f32 %v2349_v8 }
 0x609   :  { %3596 = vpow2.f32 %v3282_v39 }
 0x612   :  { %v3591_v41 = vpop.eup %3590 }
 0x613   :  { %v2354_v40 = vadd.f32 1.0, %v3591_v41 }
 0x614   :  { %v3593_v43 = vpop.eup %3592 }
 0x615   :  { %3598 = vrcp.f32 %v2354_v40  ;;  %v2360_v45 = vadd.f32 1.0, %v3593_v43  ;;  %v3595_v46 = vpop.eup %3594 }
 0x616   :  { %v3597_v3 = vpop.eup %3596 }
 0x617   :  { %3600 = vrcp.f32 %v2360_v45  ;;  %v2367_v51 = vadd.f32 1.0, %v3597_v3  ;;  %v4349_v45 = vld [vmem:[#allocation34_spill] sm:$0xff] }
 0x619   :  { %3602 = vrcp.f32 %v2367_v51 }
 0x622   :  { %v3599_v48 = vpop.eup %3598 }
 0x623   :  { %v2372_v47 = vmul.f32 %v3599_v48, %v3595_v46 }
 0x624   :  { %v3601_v50 = vpop.eup %3600 }
 0x625   :  { %v2371_v52 = vmul.f32 %v3601_v50, %v4206_v49 }
 0x626   :  { %v3603_v54 = vpop.eup %3602 }
 0x627   :  { %v4251_v42 = vadd.f32 %v2372_v47, %v2371_v52 }
 0x629   :  { %3604 = vtanh.f32 %v4251_v42 }
 0x636   :  { %v3605_v55 = vpop.eup %3604 }
 0x637   :  { %v2375_v56 = vmul.f32 %v3605_v55, %v3603_v54 }
 0x639   :  { %3283 = vst [vmem:[%s4307_s4 + $0x28] sm:$0xff] %v2375_v56  ;;  %v2390_v57 = vpack.c.bf16 %v2375_v56, %v2375_v56 }
 0x63b   :  { %2616 = vmatmul.mubr.bf16.vlgmr.msra.gmra.mxu0 %v2390_v57  ;;  %2657 = vmatmul.mubr.bf16.vlgmr.msra.gmra.mxu1 %v2390_v57 }
 0x63c   :  { %2902 = vmatpush1.bf16.msra.mxu0 %v4062_v17  ;;  %2943 = vmatpush1.bf16.msra.mxu1 %v4064_v23  ;;  %v4344_v23 = vld [vmem:[#allocation29_spill] sm:$0xff] }
 0x63d   :  { %2903 = vmatprep.subr.bf16.mxu0 %v4070_v53  ;;  %2944 = vmatprep.subr.bf16.mxu1 %v4072_v7 }
 0x63e   :  { %2933 = vmatprep.mubr.bf16.mxu0 %v4330_v10  ;;  %2974 = vmatprep.mubr.bf16.mxu1 %v4330_v10 }
 0x640   :  { %2904 = vmatpush1.bf16.msra.mxu0 %v4074_v11  ;;  %2945 = vmatpush1.bf16.msra.mxu1 %v4076_v21 }
 0x641   :  { %2905 = vmatprep.subr.bf16.mxu0 %v4082_v35  ;;  %2946 = vmatprep.subr.bf16.mxu1 %v4084_v16  ;;  %v4345_v35 = vld [vmem:[#allocation31_spill] sm:$0xff] }
 0x644   :  { %2906 = vmatpush1.bf16.msra.mxu0 %v4086_v33  ;;  %2947 = vmatpush1.bf16.msra.mxu1 %v4088_v34 }
 0x645   :  { %2907 = vmatprep.subr.bf16.mxu0 %v4094_v9  ;;  %2948 = vmatprep.subr.bf16.mxu1 %v4096_v27 }
 0x648   :  { %2908 = vmatpush1.bf16.msra.mxu0 %v4098_v22  ;;  %2949 = vmatpush1.bf16.msra.mxu1 %v4100_v24  ;;  %v4346_v24 = vld [vmem:[#allocation32_spill] sm:$0xff] }
 0x649   :  { %2909 = vmatprep.subr.bf16.mxu0 %v4104_v18  ;;  %2950 = vmatprep.subr.bf16.mxu1 %v4106_v28  ;;  %v4347_v28 = vld [vmem:[#allocation30_spill] sm:$0xff] }
 0x64c   :  { %2910 = vmatpush1.bf16.msra.mxu0 %v4110_v20  ;;  %2951 = vmatpush1.bf16.msra.mxu1 %v4112_v0 }
 0x64d   :  { %2911 = vmatprep.subr.bf16.mxu0 %v4116_v14  ;;  %2952 = vmatprep.subr.bf16.mxu1 %v4118_v15 }
 0x650   :  { %2912 = vmatpush1.bf16.msra.mxu0 %v4122_v12  ;;  %2953 = vmatpush1.bf16.msra.mxu1 %v4124_v13 }
 0x651   :  { %2913 = vmatprep.subr.bf16.mxu0 %v4128_v29  ;;  %2954 = vmatprep.subr.bf16.mxu1 %v4130_v25 }
 0x654   :  { %2914 = vmatpush1.bf16.msra.mxu0 %v4134_v19  ;;  %2955 = vmatpush1.bf16.msra.mxu1 %v4136_v26 }
 0x655   :  { %2915 = vmatprep.subr.bf16.mxu0 %v4140_v30  ;;  %2956 = vmatprep.subr.bf16.mxu1 %v4142_v36 }
 0x658   :  { %2916 = vmatpush1.bf16.msra.mxu0 %v4146_v37  ;;  %2957 = vmatpush1.bf16.msra.mxu1 %v4148_v38 }
 0x6fb   :  { %v2617_v10 = vpop.f32.mrf.mxu0  ;;  %v2658_v17 = vpop.f32.mrf.mxu1 }
 0x6fc   :  { %v2665_v53 = vadd.f32 %v2617_v10, %v4344_v23  ;;  %v2667_v20 = vadd.f32 %v2658_v17, %v4347_v28 }
 0x6fd   :  { %v2619_v7 = vpop.f32.mrf.mxu0  ;;  %v2660_v11 = vpop.f32.mrf.mxu1 }
 0x6fe   :  { %v3316_v21 = vmul.f32 -1.442695, %v2665_v53  ;;  %v2666_v16 = vadd.f32 %v2619_v7, %v4345_v35  ;;  %v2668_v18 = vadd.f32 %v2660_v11, %v4346_v24 }
 0x6ff   :  { %v2621_v33 = vpop.f32.mrf.mxu0  ;;  %v2662_v34 = vpop.f32.mrf.mxu1 }
 0x700   :  { %3606 = vpow2.f32 %v3316_v21  ;;  %v3317_v9 = vmul.f32 -1.442695, %v2666_v16  ;;  %v3318_v0 = vmul.f32 -1.442695, %v2668_v18 }
 0x701   :  { %v2622_v27 = vpop.f32.mrf.mxu0  ;;  %v2663_v22 = vpop.f32.mrf.mxu1 }
 0x702   :  { %3608 = vpow2.f32 %v3317_v9 }
 0x703   :  { %3610 = vtanh.f32 %v2667_v20 }
 0x704   :  { %3612 = vpow2.f32 %v3318_v0 }
 0x70d   :  { %v3607_v14 = vpop.eup %3606 }
 0x70e   :  { %v2672_v15 = vadd.f32 1.0, %v3607_v14 }
 0x70f   :  { %v3609_v12 = vpop.eup %3608 }
 0x710   :  { %3614 = vrcp.f32 %v2672_v15  ;;  %v2678_v13 = vadd.f32 1.0, %v3609_v12  ;;  %v3611_v29 = vpop.eup %3610 }
 0x711   :  { %v3613_v25 = vpop.eup %3612 }
 0x712   :  { %3616 = vrcp.f32 %v2678_v13  ;;  %v2685_v36 = vadd.f32 1.0, %v3613_v25 }
 0x714   :  { %3618 = vrcp.f32 %v2685_v36 }
 0x71d   :  { %v3615_v19 = vpop.eup %3614 }
 0x71e   :  { %v2690_v26 = vmul.f32 %v3615_v19, %v3611_v29 }
 0x71f   :  { %v3617_v30 = vpop.eup %3616 }
 0x720   :  { %v2689_v37 = vmul.f32 %v3617_v30, %v4251_v42 }
 0x721   :  { %v3619_v49 = vpop.eup %3618 }
 0x722   :  { %v2691_v38 = vadd.f32 %v2690_v26, %v2689_v37 }
 0x724   :  { %3620 = vtanh.f32 %v2691_v38 }
 0x731   :  { %v3621_v58 = vpop.eup %3620 }
 0x732   :  { %v2693_v59 = vmul.f32 %v3621_v58, %v3619_v49 }
 0x734   :  { %3319 = vst [vmem:[%s4307_s4 + $0x30] sm:$0xff] %v2693_v59  ;;  %v2708_v60 = vpack.c.bf16 %v2693_v59, %v2693_v59 }
 0x736   :  { %2934 = vmatmul.mubr.bf16.vlgmr.msra.gmra.mxu0 %v2708_v60  ;;  %2975 = vmatmul.mubr.bf16.vlgmr.msra.gmra.mxu1 %v2708_v60 }
 0x7f6   :  { %v2935_v61 = vpop.f32.mrf.mxu0  ;;  %v2976_v63 = vpop.f32.mrf.mxu1 }
 0x7f7   :  { %v2983_v2 = vadd.f32 %v2935_v61, %v4348_v1  ;;  %v2985_v46 = vadd.f32 %v2976_v63, %v4349_v45 }
 0x7f8   :  { %v2937_v4 = vpop.f32.mrf.mxu0  ;;  %v2978_v5 = vpop.f32.mrf.mxu1 }
 0x7f9   :  { %v3352_v32 = vmul.f32 -1.442695, %v2983_v2  ;;  %v2984_v6 = vadd.f32 %v2937_v4, %v3952_v31  ;;  %v2986_v43 = vadd.f32 %v2978_v5, %v3955_v44 }
 0x7fa   :  { %v2939_v62 = vpop.f32.mrf.mxu0  ;;  %v2980_v8 = vpop.f32.mrf.mxu1 }
 0x7fb   :  { %3622 = vpow2.f32 %v3352_v32  ;;  %v3353_v39 = vmul.f32 -1.442695, %v2984_v6  ;;  %v3354_v3 = vmul.f32 -1.442695, %v2986_v43 }
 0x7fc   :  { %v2940_v41 = vpop.f32.mrf.mxu0  ;;  %v2981_v40 = vpop.f32.mrf.mxu1 }
 0x7fd   :  { %3624 = vpow2.f32 %v3353_v39 }
 0x7fe   :  { %3626 = vtanh.f32 %v2985_v46 }
 0x7ff   :  { %3628 = vpow2.f32 %v3354_v3 }
 0x808   :  { %v3623_v48 = vpop.eup %3622 }
 0x809   :  { %v2990_v47 = vadd.f32 1.0, %v3623_v48 }
 0x80a   :  { %v3625_v50 = vpop.eup %3624 }
 0x80b   :  { %3630 = vrcp.f32 %v2990_v47  ;;  %v2996_v51 = vadd.f32 1.0, %v3625_v50  ;;  %v3627_v31 = vpop.eup %3626 }
 0x80c   :  { %v3629_v52 = vpop.eup %3628 }
 0x80d   :  { %3632 = vrcp.f32 %v2996_v51  ;;  %v3003_v56 = vadd.f32 1.0, %v3629_v52 }
 0x80f   :  { %3634 = vrcp.f32 %v3003_v56 }
 0x818   :  { %v3631_v42 = vpop.eup %3630 }
 0x819   :  { %v3008_v54 = vmul.f32 %v3631_v42, %v3627_v31 }
 0x81a   :  { %v3633_v55 = vpop.eup %3632 }
 0x81b   :  { %v3007_v57 = vmul.f32 %v3633_v55, %v2691_v38 }
 0x81c   :  { %v3635_v44 = vpop.eup %3634 }
 0x81d   :  { %v3009_v10 = vadd.f32 %v3008_v54, %v3007_v57 }
 0x81f   :  { %3636 = vtanh.f32 %v3009_v10 }
 0x82c   :  { %v3637_v17 = vpop.eup %3636 }
 0x82d   :  { %v3011_v23 = vmul.f32 %v3637_v17, %v3635_v44 }
 0x82f   :  { %3355 = vst [vmem:[%s4307_s4 + $0x38] sm:$0xff] %v3011_v23 }
 0x830   :  { %3020 = vsyncmov [#allocation7] }
 0x833   :  { %s3021_s21 = vpop.sfrf %3020 }
 0x834   :  { %p3356_p10 = scmp.ne.s32.totalorder %s3021_s21, 0 }
 0x836   :  { %3025 = shalt.err (%p3356_p10)  }
 0x837   :  { %3027 = vsyncmov [#allocation7 + $0x1] }
 0x83a   :  { %s3028_s22 = vpop.sfrf %3027 }
 0x83b   :  { %p3357_p11 = scmp.ne.s32.totalorder %s3028_s22, 0 }
 0x83d   :  { %3032 = shalt.err (%p3357_p11)  }

</bundles_post_ra>
